<compile_context>
chip_gen: v5e
topology: v5e:2x2
jax: 0.10.0
libtpu: 0.0.40
codegen_flags: <defaults>
</compile_context>

<pallas_src>
import functools

import jax
import jax.numpy as jnp
from jax import lax
from jax.experimental import pallas as pl
from jax.experimental.pallas import tpu as pltpu

BN_EPS = 1e-5


def bn_fold(kg, kb, c):
    gamma = 1.0 + 0.1 * jax.random.normal(kg, (c,), jnp.float32)
    beta = 0.1 * jax.random.normal(kb, (c,), jnp.float32)
    running_mean = jnp.zeros((c,), jnp.float32)
    running_var = jnp.ones((c,), jnp.float32)
    scale = gamma / jnp.sqrt(running_var + BN_EPS)
    bias = beta - running_mean * scale
    return scale, bias


# ----------------------------------------------------------------------------
# Fused Pallas kernel: one grid step == one image, channels on lanes.
# ----------------------------------------------------------------------------
def _bottleneck_kernel(x_ref, w1_ref, b1_ref, w2_ref, b2_ref, w3_ref, b3_ref,
                       o_ref, y1_ref, *xtra, stride, H, W, Ho, Wo,
                       cin, mid, cout):
    f32 = jnp.float32
    s = stride
    Hp, Wp = H + 2, W + 2
    xp_ref = xtra[0] if s == 2 else None

    # ---- conv1: grouped 1x1 (shuffle + BN folded) as one MXU matmul --------
    x_hw = x_ref[0].astype(f32)                       # (H, W, Cin)
    x_flat = x_hw.reshape(H * W, cin)                 # channels on lanes
    y1 = jnp.dot(x_flat, w1_ref[...], preferred_element_type=f32) + b1_ref[...]
    y1 = jnp.maximum(y1, 0.0)

    # Zero-halo VMEM scratch; writing only the interior *is* the 3x3 padding.
    y1_ref[...] = jnp.zeros((Hp, Wp, mid), f32)
    y1_ref[1:H + 1, 1:W + 1, :] = y1.reshape(H, W, mid)

    if s == 2:
        xp_ref[...] = jnp.zeros((Hp, Wp, cin), f32)
        xp_ref[1:H + 1, 1:W + 1, :] = x_hw

    # ---- shifted (and stride-decimated) windows of a padded scratch -------
    def col_block(ref, dj, ncols):
        # all Hp rows; columns dj, dj+s, ..., dj+s*(ncols-1)
        if s == 1:
            return ref[:, dj:dj + ncols, :]
        return ref[:, pl.ds(dj, ncols, 2), :]         # sublane-strided load

    def row_select(blk, di, nrows):
        # rows di, di+s, ..., di+s*(nrows-1); leading-dim ops only (free)
        if s == 1:
            return blk[di:di + nrows]
        sub = blk[di:di + 2 * nrows]                  # (2*nrows, ncols, C)
        return sub.reshape(nrows, 2, sub.shape[1], sub.shape[2])[:, 0]

    # ---- conv2: depthwise 3x3 (BN folded) on the VPU, channels on lanes ----
    acc = None
    for dj in range(3):
        cb = col_block(y1_ref, dj, Wo)                # (Hp, Wo, mid)
        for di in range(3):
            tap = row_select(cb, di, Ho)              # (Ho, Wo, mid)
            contrib = w2_ref[3 * di + dj] * tap
            acc = contrib if acc is None else acc + contrib
    y2 = jnp.maximum(acc + b2_ref[0], 0.0)            # (Ho, Wo, mid)

    # ---- conv3: grouped 1x1 (BN folded) as one MXU matmul ------------------
    y2_flat = y2.reshape(Ho * Wo, mid)
    y3 = jnp.dot(y2_flat, w3_ref[...], preferred_element_type=f32) + b3_ref[...]

    if s == 1:
        # residual add (Cin == Cout) + ReLU; single lane-dense store.
        o_ref[0] = jnp.maximum(y3 + x_flat, 0.0).astype(o_ref.dtype)
    else:
        o_ref[0, :, 0:cout] = jnp.maximum(y3, 0.0).astype(o_ref.dtype)
        # Shortcut: AvgPool2d(3, stride=2, pad=1), count_include_pad, + ReLU.
        pacc = None
        for dj in range(3):
            cb = col_block(xp_ref, dj, Wo)
            for di in range(3):
                tap = row_select(cb, di, Ho)
                pacc = tap if pacc is None else pacc + tap
        pool = (pacc * (1.0 / 9.0)).reshape(Ho * Wo, cin)
        o_ref[0, :, cout:cout + cin] = jnp.maximum(pool, 0.0).astype(o_ref.dtype)


# ----------------------------------------------------------------------------
# Module wrapper: folds shuffle + BN into dense block-diagonal 1x1 weights.
# ----------------------------------------------------------------------------
class BottleneckPallas:
    def __init__(self, in_channels, out_channels, stride, groups, key):
        mid = out_channels // 4
        self.g1 = 1 if in_channels == 24 else groups
        self.g3 = groups
        self.stride = stride
        self.in_ch, self.out_ch, self.mid = in_channels, out_channels, mid

        ing1 = in_channels // self.g1
        cpg1 = mid // self.g1
        ing3 = mid // self.g3
        cpg3 = out_channels // self.g3
        ks = jax.random.split(key, 9)

        # conv1: grouped 1x1 (torch OIHW kept for the pure-JAX reference)
        w1 = 0.2 * jax.random.normal(ks[0], (mid, ing1), jnp.float32)
        self.w1_oihw = w1.reshape(mid, ing1, 1, 1)
        self.s1, self.b1 = bn_fold(ks[1], ks[2], mid)

        # conv2: depthwise 3x3
        w2 = 0.2 * jax.random.normal(ks[3], (mid, 3, 3), jnp.float32)
        self.w2_oihw = w2.reshape(mid, 1, 3, 3)
        self.s2, self.b2 = bn_fold(ks[4], ks[5], mid)

        # conv3: grouped 1x1
        w3 = 0.2 * jax.random.normal(ks[6], (out_channels, ing3), jnp.float32)
        self.w3_oihw = w3.reshape(out_channels, ing3, 1, 1)
        self.s3, self.b3 = bn_fold(ks[7], ks[8], out_channels)

        # ---- fold shuffle + BN scales into dense block-diagonal matrices ---
        perm = [(j % self.g1) * cpg1 + (j // self.g1) for j in range(mid)]
        w1d = jnp.zeros((in_channels, mid), jnp.float32)
        for j, p in enumerate(perm):
            base = (p // cpg1) * ing1
            w1d = w1d.at[base:base + ing1, j].set(w1[p] * self.s1[p])
        self.w1d = w1d                                    # (Cin, Mid)
        self.b1f = self.b1[jnp.array(perm)][None, :]      # (1, Mid)

        self.w2f = (w2 * self.s2[:, None, None]).reshape(mid, 9).T  # (9, Mid)
        self.b2f = self.b2[None, :]                       # (1, Mid)

        w3d = jnp.zeros((mid, out_channels), jnp.float32)
        for o in range(out_channels):
            base = (o // cpg3) * ing3
            w3d = w3d.at[base:base + ing3, o].set(w3[o] * self.s3[o])
        self.w3d = w3d                                    # (Mid, Cout)
        self.b3f = self.b3[None, :]                       # (1, Cout)

    def __call__(self, x_nchw):
        n, cin, h, w = x_nchw.shape
        s, mid, cout = self.stride, self.mid, self.out_ch
        if s == 2:
            assert h % 2 == 0 and w % 2 == 0   # TODO(synk): odd-size support
            ho, wo = h // 2, w // 2
            c_total = cout + cin
        else:
            ho, wo = h, w
            c_total = cout
        hp, wp = h + 2, w + 2

        # Layout plumbing only: channels-last in, channels-last lane-dense out.
        x_nhwc = jnp.transpose(x_nchw, (0, 2, 3, 1))

        kern = functools.partial(
            _bottleneck_kernel, stride=s, H=h, W=w, Ho=ho, Wo=wo,
            cin=cin, mid=mid, cout=cout)

        scratch = [pltpu.VMEM((hp, wp, mid), jnp.float32)]
        if s == 2:
            scratch.append(pltpu.VMEM((hp, wp, cin), jnp.float32))

        out = pl.pallas_call(
            kern,
            out_shape=jax.ShapeDtypeStruct((n, ho * wo, c_total), x_nchw.dtype),
            grid=(n,),
            in_specs=[
                pl.BlockSpec((1, h, w, cin), lambda i: (i, 0, 0, 0)),
                pl.BlockSpec((cin, mid), lambda i: (0, 0)),
                pl.BlockSpec((1, mid), lambda i: (0, 0)),
                pl.BlockSpec((9, mid), lambda i: (0, 0)),
                pl.BlockSpec((1, mid), lambda i: (0, 0)),
                pl.BlockSpec((mid, cout), lambda i: (0, 0)),
                pl.BlockSpec((1, cout), lambda i: (0, 0)),
            ],
            out_specs=pl.BlockSpec((1, ho * wo, c_total), lambda i: (i, 0, 0)),
            scratch_shapes=scratch,
            compiler_params=pltpu.CompilerParams(
                dimension_semantics=("parallel",)),
        )(x_nhwc, self.w1d, self.b1f, self.w2f, self.b2f, self.w3d, self.b3f)

        return jnp.transpose(out.reshape(n, ho, wo, c_total), (0, 3, 1, 2))


# ----------------------------------------------------------------------------
# Pure-JAX reference (NCHW, mirrors the PyTorch forward) for verification
# ----------------------------------------------------------------------------
def ref_forward(m, x):
    def conv(inp, w, stride=1, padding=0, groups=1):
        return lax.conv_general_dilated(
            inp, w, window_strides=(stride, stride),
            padding=[(padding, padding), (padding, padding)],
            feature_group_count=groups,
            dimension_numbers=('NCHW', 'OIHW', 'NCHW'))

    def bn(inp, scale, bias):
        return inp * scale[None, :, None, None] + bias[None, :, None, None]

    out = jax.nn.relu(bn(conv(x, m.w1_oihw, groups=m.g1), m.s1, m.b1))
    n, c, h, w = out.shape
    out = (out.reshape(n, m.g1, c // m.g1, h, w)
           .transpose(0, 2, 1, 3, 4).reshape(n, c, h, w))
    out = jax.nn.relu(bn(conv(out, m.w2_oihw, stride=m.stride, padding=1,
                              groups=m.mid), m.s2, m.b2))
    out = bn(conv(out, m.w3_oihw, groups=m.g3), m.s3, m.b3)
    if m.stride == 2:
        res = lax.reduce_window(x, 0.0, lax.add, (1, 1, 3, 3), (1, 1, 2, 2),
                                [(0, 0), (0, 0), (1, 1), (1, 1)]) / 9.0
        out = jax.nn.relu(jnp.concatenate([out, res], axis=1))
    else:
        out = jax.nn.relu(out + x)
    return out


if __name__ == "__main__":
    key = jax.random.PRNGKey(0)
    k_x, k_p1, k_p2 = jax.random.split(key, 3)

    x = jax.random.normal(k_x, (2, 8, 16, 16), jnp.float32)   # NCHW

    # stride=2 branch (concat with AvgPool shortcut): in=8, out=16, groups=2.
    m2 = BottleneckPallas(in_channels=8, out_channels=16, stride=2, groups=2,
                          key=k_p1)
    y2 = jax.block_until_ready(m2(x))
    r2 = jax.block_until_ready(ref_forward(m2, x))
    assert y2.shape == (2, 16 + 8, 8, 8), y2.shape
    assert jnp.allclose(y2, r2, atol=2e-4, rtol=2e-4), \
        float(jnp.max(jnp.abs(y2 - r2)))

    # stride=1 branch (residual add): in=8, out=8, groups=2.
    m1 = BottleneckPallas(in_channels=8, out_channels=8, stride=1, groups=2,
                          key=k_p2)
    y1 = jax.block_until_ready(m1(x))
    r1 = jax.block_until_ready(ref_forward(m1, x))
    assert y1.shape == (2, 8, 16, 16), y1.shape
    assert jnp.allclose(y1, r1, atol=2e-4, rtol=2e-4), \
        float(jnp.max(jnp.abs(y1 - r1)))

    print("KERNEL_OK")
</pallas_src>

<mosaic_0001>
module attributes {stable_mosaic.version = 11 : i64} {
  func.func @_bottleneck_kernel(%arg0: i32, %arg1: memref<1x16x16x8xf32, #tpu.memory_space<vmem>>, %arg2: memref<8x4xf32, #tpu.memory_space<vmem>>, %arg3: memref<1x4xf32, #tpu.memory_space<vmem>>, %arg4: memref<9x4xf32, #tpu.memory_space<vmem>>, %arg5: memref<1x4xf32, #tpu.memory_space<vmem>>, %arg6: memref<4x16xf32, #tpu.memory_space<vmem>>, %arg7: memref<1x16xf32, #tpu.memory_space<vmem>>, %arg8: memref<1x64x24xf32, #tpu.memory_space<vmem>>, %arg9: memref<18x18x4xf32, #tpu.memory_space<vmem>>, %arg10: memref<18x18x8xf32, #tpu.memory_space<vmem>>) attributes {dimension_semantics = [#tpu.dimension_semantics<parallel>], iteration_bounds = array<i64: 2>, scalar_prefetch = 0 : i64, scratch_operands = 2 : i64, tpu.core_type = #tpu.core_type<tc>, window_params = [{transform_indices = @transform_0, window_bounds = array<i64: 1, 16, 16, 8>}, {pipeline_mode = #tpu.pipeline_mode<synchronous>, transform_indices = @transform_1, window_bounds = array<i64: 8, 4>}, {pipeline_mode = #tpu.pipeline_mode<synchronous>, transform_indices = @transform_2, window_bounds = array<i64: 1, 4>}, {pipeline_mode = #tpu.pipeline_mode<synchronous>, transform_indices = @transform_3, window_bounds = array<i64: 9, 4>}, {pipeline_mode = #tpu.pipeline_mode<synchronous>, transform_indices = @transform_4, window_bounds = array<i64: 1, 4>}, {pipeline_mode = #tpu.pipeline_mode<synchronous>, transform_indices = @transform_5, window_bounds = array<i64: 4, 16>}, {pipeline_mode = #tpu.pipeline_mode<synchronous>, transform_indices = @transform_6, window_bounds = array<i64: 1, 16>}, {transform_indices = @transform_7, window_bounds = array<i64: 1, 64, 24>}]} {
    %c0 = arith.constant 0 : index
    %c0_0 = arith.constant 0 : index
    %c0_1 = arith.constant 0 : index
    %c0_2 = arith.constant 0 : index
    %0 = vector.load %arg1[%c0, %c0_0, %c0_1, %c0_2] : memref<1x16x16x8xf32, #tpu.memory_space<vmem>>, vector<1x16x16x8xf32>
    %1 = vector.shape_cast %0 : vector<1x16x16x8xf32> to vector<16x16x8xf32>
    %2 = vector.shape_cast %1 : vector<16x16x8xf32> to vector<256x8xf32>
    %c0_3 = arith.constant 0 : index
    %c0_4 = arith.constant 0 : index
    %3 = vector.load %arg2[%c0_3, %c0_4] : memref<8x4xf32, #tpu.memory_space<vmem>>, vector<8x4xf32>
    %cst = arith.constant dense<0.000000e+00> : vector<256x4xf32>
    %4 = tpu.matmul %2, %3, %cst {dimension_numbers = #tpu.dot_dimension_numbers<[1], [0], [0], [1], [0, 0, 1, 1], [], []>} : vector<256x8xf32>, vector<8x4xf32>, vector<256x4xf32> -> vector<256x4xf32>
    %c0_5 = arith.constant 0 : index
    %c0_6 = arith.constant 0 : index
    %5 = vector.load %arg3[%c0_5, %c0_6] : memref<1x4xf32, #tpu.memory_space<vmem>>, vector<1x4xf32>
    %6 = vector.broadcast %5 : vector<1x4xf32> to vector<256x4xf32>
    %7 = arith.addf %4, %6 : vector<256x4xf32>
    %cst_7 = arith.constant 0.000000e+00 : f32
    %8 = vector.broadcast %cst_7 : f32 to vector<256x4xf32>
    %9 = arith.maximumf %7, %8 : vector<256x4xf32>
    %cst_8 = arith.constant 0.000000e+00 : f32
    %10 = vector.broadcast %cst_8 : f32 to vector<18x18x4xf32>
    %c0_9 = arith.constant 0 : index
    %c0_10 = arith.constant 0 : index
    %c0_11 = arith.constant 0 : index
    %11 = vector.load %arg9[%c0_9, %c0_10, %c0_11] : memref<18x18x4xf32, #tpu.memory_space<vmem>>, vector<18x18x4xf32>
    tpu.vector_store %arg9[%c0_9, %c0_10, %c0_11], %10 {strides = array<i32>} : memref<18x18x4xf32, #tpu.memory_space<vmem>>, vector<18x18x4xf32>,
    %12 = vector.shape_cast %9 : vector<256x4xf32> to vector<16x16x4xf32>
    %c1 = arith.constant 1 : index
    %c1_12 = arith.constant 1 : index
    %c0_13 = arith.constant 0 : index
    %13 = vector.load %arg9[%c1, %c1_12, %c0_13] : memref<18x18x4xf32, #tpu.memory_space<vmem>>, vector<16x16x4xf32>
    tpu.vector_store %arg9[%c1, %c1_12, %c0_13], %12 {strides = array<i32>} : memref<18x18x4xf32, #tpu.memory_space<vmem>>, vector<16x16x4xf32>,
    %cst_14 = arith.constant 0.000000e+00 : f32
    %14 = vector.broadcast %cst_14 : f32 to vector<18x18x8xf32>
    %c0_15 = arith.constant 0 : index
    %c0_16 = arith.constant 0 : index
    %c0_17 = arith.constant 0 : index
    %15 = vector.load %arg10[%c0_15, %c0_16, %c0_17] : memref<18x18x8xf32, #tpu.memory_space<vmem>>, vector<18x18x8xf32>
    tpu.vector_store %arg10[%c0_15, %c0_16, %c0_17], %14 {strides = array<i32>} : memref<18x18x8xf32, #tpu.memory_space<vmem>>, vector<18x18x8xf32>,
    %c1_18 = arith.constant 1 : index
    %c1_19 = arith.constant 1 : index
    %c0_20 = arith.constant 0 : index
    %16 = vector.load %arg10[%c1_18, %c1_19, %c0_20] : memref<18x18x8xf32, #tpu.memory_space<vmem>>, vector<16x16x8xf32>
    tpu.vector_store %arg10[%c1_18, %c1_19, %c0_20], %1 {strides = array<i32>} : memref<18x18x8xf32, #tpu.memory_space<vmem>>, vector<16x16x8xf32>,
    %c0_21 = arith.constant 0 : index
    %c0_22 = arith.constant 0 : index
    %c0_23 = arith.constant 0 : index
    %17 = tpu.strided_load %arg9[%c0_21, %c0_22, %c0_23] {strides = array<i32: 1, 2, 1>} : memref<18x18x4xf32, #tpu.memory_space<vmem>>, vector<18x8x4xf32>
    %18 = vector.extract_strided_slice %17 {offsets = [0, 0, 0], sizes = [16, 8, 4], strides = [1, 1, 1]} : vector<18x8x4xf32> to vector<16x8x4xf32>
    %19 = vector.shape_cast %18 : vector<16x8x4xf32> to vector<8x2x8x4xf32>
    %20 = vector.extract_strided_slice %19 {offsets = [0, 0, 0, 0], sizes = [8, 1, 8, 4], strides = [1, 1, 1, 1]} : vector<8x2x8x4xf32> to vector<8x1x8x4xf32>
    %21 = vector.shape_cast %20 : vector<8x1x8x4xf32> to vector<8x8x4xf32>
    %c0_24 = arith.constant 0 : index
    %c0_25 = arith.constant 0 : index
    %22 = vector.load %arg4[%c0_24, %c0_25] : memref<9x4xf32, #tpu.memory_space<vmem>>, vector<1x4xf32>
    %23 = vector.shape_cast %22 : vector<1x4xf32> to vector<4xf32>
    %24 = vector.shape_cast %23 : vector<4xf32> to vector<1x1x4xf32>
    %25 = vector.broadcast %24 : vector<1x1x4xf32> to vector<8x8x4xf32>
    %26 = arith.mulf %25, %21 : vector<8x8x4xf32>
    %27 = vector.extract_strided_slice %17 {offsets = [1, 0, 0], sizes = [16, 8, 4], strides = [1, 1, 1]} : vector<18x8x4xf32> to vector<16x8x4xf32>
    %28 = vector.shape_cast %27 : vector<16x8x4xf32> to vector<8x2x8x4xf32>
    %29 = vector.extract_strided_slice %28 {offsets = [0, 0, 0, 0], sizes = [8, 1, 8, 4], strides = [1, 1, 1, 1]} : vector<8x2x8x4xf32> to vector<8x1x8x4xf32>
    %30 = vector.shape_cast %29 : vector<8x1x8x4xf32> to vector<8x8x4xf32>
    %c3 = arith.constant 3 : index
    %c0_26 = arith.constant 0 : index
    %31 = vector.load %arg4[%c3, %c0_26] : memref<9x4xf32, #tpu.memory_space<vmem>>, vector<1x4xf32>
    %32 = vector.shape_cast %31 : vector<1x4xf32> to vector<4xf32>
    %33 = vector.shape_cast %32 : vector<4xf32> to vector<1x1x4xf32>
    %34 = vector.broadcast %33 : vector<1x1x4xf32> to vector<8x8x4xf32>
    %35 = arith.mulf %34, %30 : vector<8x8x4xf32>
    %36 = arith.addf %26, %35 : vector<8x8x4xf32>
    %37 = vector.extract_strided_slice %17 {offsets = [2, 0, 0], sizes = [16, 8, 4], strides = [1, 1, 1]} : vector<18x8x4xf32> to vector<16x8x4xf32>
    %38 = vector.shape_cast %37 : vector<16x8x4xf32> to vector<8x2x8x4xf32>
    %39 = vector.extract_strided_slice %38 {offsets = [0, 0, 0, 0], sizes = [8, 1, 8, 4], strides = [1, 1, 1, 1]} : vector<8x2x8x4xf32> to vector<8x1x8x4xf32>
    %40 = vector.shape_cast %39 : vector<8x1x8x4xf32> to vector<8x8x4xf32>
    %c6 = arith.constant 6 : index
    %c0_27 = arith.constant 0 : index
    %41 = vector.load %arg4[%c6, %c0_27] : memref<9x4xf32, #tpu.memory_space<vmem>>, vector<1x4xf32>
    %42 = vector.shape_cast %41 : vector<1x4xf32> to vector<4xf32>
    %43 = vector.shape_cast %42 : vector<4xf32> to vector<1x1x4xf32>
    %44 = vector.broadcast %43 : vector<1x1x4xf32> to vector<8x8x4xf32>
    %45 = arith.mulf %44, %40 : vector<8x8x4xf32>
    %46 = arith.addf %36, %45 : vector<8x8x4xf32>
    %c0_28 = arith.constant 0 : index
    %c1_29 = arith.constant 1 : index
    %c0_30 = arith.constant 0 : index
    %47 = tpu.strided_load %arg9[%c0_28, %c1_29, %c0_30] {strides = array<i32: 1, 2, 1>} : memref<18x18x4xf32, #tpu.memory_space<vmem>>, vector<18x8x4xf32>
    %48 = vector.extract_strided_slice %47 {offsets = [0, 0, 0], sizes = [16, 8, 4], strides = [1, 1, 1]} : vector<18x8x4xf32> to vector<16x8x4xf32>
    %49 = vector.shape_cast %48 : vector<16x8x4xf32> to vector<8x2x8x4xf32>
    %50 = vector.extract_strided_slice %49 {offsets = [0, 0, 0, 0], sizes = [8, 1, 8, 4], strides = [1, 1, 1, 1]} : vector<8x2x8x4xf32> to vector<8x1x8x4xf32>
    %51 = vector.shape_cast %50 : vector<8x1x8x4xf32> to vector<8x8x4xf32>
    %c1_31 = arith.constant 1 : index
    %c0_32 = arith.constant 0 : index
    %52 = vector.load %arg4[%c1_31, %c0_32] : memref<9x4xf32, #tpu.memory_space<vmem>>, vector<1x4xf32>
    %53 = vector.shape_cast %52 : vector<1x4xf32> to vector<4xf32>
    %54 = vector.shape_cast %53 : vector<4xf32> to vector<1x1x4xf32>
    %55 = vector.broadcast %54 : vector<1x1x4xf32> to vector<8x8x4xf32>
    %56 = arith.mulf %55, %51 : vector<8x8x4xf32>
    %57 = arith.addf %46, %56 : vector<8x8x4xf32>
    %58 = vector.extract_strided_slice %47 {offsets = [1, 0, 0], sizes = [16, 8, 4], strides = [1, 1, 1]} : vector<18x8x4xf32> to vector<16x8x4xf32>
    %59 = vector.shape_cast %58 : vector<16x8x4xf32> to vector<8x2x8x4xf32>
    %60 = vector.extract_strided_slice %59 {offsets = [0, 0, 0, 0], sizes = [8, 1, 8, 4], strides = [1, 1, 1, 1]} : vector<8x2x8x4xf32> to vector<8x1x8x4xf32>
    %61 = vector.shape_cast %60 : vector<8x1x8x4xf32> to vector<8x8x4xf32>
    %c4 = arith.constant 4 : index
    %c0_33 = arith.constant 0 : index
    %62 = vector.load %arg4[%c4, %c0_33] : memref<9x4xf32, #tpu.memory_space<vmem>>, vector<1x4xf32>
    %63 = vector.shape_cast %62 : vector<1x4xf32> to vector<4xf32>
    %64 = vector.shape_cast %63 : vector<4xf32> to vector<1x1x4xf32>
    %65 = vector.broadcast %64 : vector<1x1x4xf32> to vector<8x8x4xf32>
    %66 = arith.mulf %65, %61 : vector<8x8x4xf32>
    %67 = arith.addf %57, %66 : vector<8x8x4xf32>
    %68 = vector.extract_strided_slice %47 {offsets = [2, 0, 0], sizes = [16, 8, 4], strides = [1, 1, 1]} : vector<18x8x4xf32> to vector<16x8x4xf32>
    %69 = vector.shape_cast %68 : vector<16x8x4xf32> to vector<8x2x8x4xf32>
    %70 = vector.extract_strided_slice %69 {offsets = [0, 0, 0, 0], sizes = [8, 1, 8, 4], strides = [1, 1, 1, 1]} : vector<8x2x8x4xf32> to vector<8x1x8x4xf32>
    %71 = vector.shape_cast %70 : vector<8x1x8x4xf32> to vector<8x8x4xf32>
    %c7 = arith.constant 7 : index
    %c0_34 = arith.constant 0 : index
    %72 = vector.load %arg4[%c7, %c0_34] : memref<9x4xf32, #tpu.memory_space<vmem>>, vector<1x4xf32>
    %73 = vector.shape_cast %72 : vector<1x4xf32> to vector<4xf32>
    %74 = vector.shape_cast %73 : vector<4xf32> to vector<1x1x4xf32>
    %75 = vector.broadcast %74 : vector<1x1x4xf32> to vector<8x8x4xf32>
    %76 = arith.mulf %75, %71 : vector<8x8x4xf32>
    %77 = arith.addf %67, %76 : vector<8x8x4xf32>
    %c0_35 = arith.constant 0 : index
    %c2 = arith.constant 2 : index
    %c0_36 = arith.constant 0 : index
    %78 = tpu.strided_load %arg9[%c0_35, %c2, %c0_36] {strides = array<i32: 1, 2, 1>} : memref<18x18x4xf32, #tpu.memory_space<vmem>>, vector<18x8x4xf32>
    %79 = vector.extract_strided_slice %78 {offsets = [0, 0, 0], sizes = [16, 8, 4], strides = [1, 1, 1]} : vector<18x8x4xf32> to vector<16x8x4xf32>
    %80 = vector.shape_cast %79 : vector<16x8x4xf32> to vector<8x2x8x4xf32>
    %81 = vector.extract_strided_slice %80 {offsets = [0, 0, 0, 0], sizes = [8, 1, 8, 4], strides = [1, 1, 1, 1]} : vector<8x2x8x4xf32> to vector<8x1x8x4xf32>
    %82 = vector.shape_cast %81 : vector<8x1x8x4xf32> to vector<8x8x4xf32>
    %c2_37 = arith.constant 2 : index
    %c0_38 = arith.constant 0 : index
    %83 = vector.load %arg4[%c2_37, %c0_38] : memref<9x4xf32, #tpu.memory_space<vmem>>, vector<1x4xf32>
    %84 = vector.shape_cast %83 : vector<1x4xf32> to vector<4xf32>
    %85 = vector.shape_cast %84 : vector<4xf32> to vector<1x1x4xf32>
    %86 = vector.broadcast %85 : vector<1x1x4xf32> to vector<8x8x4xf32>
    %87 = arith.mulf %86, %82 : vector<8x8x4xf32>
    %88 = arith.addf %77, %87 : vector<8x8x4xf32>
    %89 = vector.extract_strided_slice %78 {offsets = [1, 0, 0], sizes = [16, 8, 4], strides = [1, 1, 1]} : vector<18x8x4xf32> to vector<16x8x4xf32>
    %90 = vector.shape_cast %89 : vector<16x8x4xf32> to vector<8x2x8x4xf32>
    %91 = vector.extract_strided_slice %90 {offsets = [0, 0, 0, 0], sizes = [8, 1, 8, 4], strides = [1, 1, 1, 1]} : vector<8x2x8x4xf32> to vector<8x1x8x4xf32>
    %92 = vector.shape_cast %91 : vector<8x1x8x4xf32> to vector<8x8x4xf32>
    %c5 = arith.constant 5 : index
    %c0_39 = arith.constant 0 : index
    %93 = vector.load %arg4[%c5, %c0_39] : memref<9x4xf32, #tpu.memory_space<vmem>>, vector<1x4xf32>
    %94 = vector.shape_cast %93 : vector<1x4xf32> to vector<4xf32>
    %95 = vector.shape_cast %94 : vector<4xf32> to vector<1x1x4xf32>
    %96 = vector.broadcast %95 : vector<1x1x4xf32> to vector<8x8x4xf32>
    %97 = arith.mulf %96, %92 : vector<8x8x4xf32>
    %98 = arith.addf %88, %97 : vector<8x8x4xf32>
    %99 = vector.extract_strided_slice %78 {offsets = [2, 0, 0], sizes = [16, 8, 4], strides = [1, 1, 1]} : vector<18x8x4xf32> to vector<16x8x4xf32>
    %100 = vector.shape_cast %99 : vector<16x8x4xf32> to vector<8x2x8x4xf32>
    %101 = vector.extract_strided_slice %100 {offsets = [0, 0, 0, 0], sizes = [8, 1, 8, 4], strides = [1, 1, 1, 1]} : vector<8x2x8x4xf32> to vector<8x1x8x4xf32>
    %102 = vector.shape_cast %101 : vector<8x1x8x4xf32> to vector<8x8x4xf32>
    %c8 = arith.constant 8 : index
    %c0_40 = arith.constant 0 : index
    %103 = vector.load %arg4[%c8, %c0_40] : memref<9x4xf32, #tpu.memory_space<vmem>>, vector<1x4xf32>
    %104 = vector.shape_cast %103 : vector<1x4xf32> to vector<4xf32>
    %105 = vector.shape_cast %104 : vector<4xf32> to vector<1x1x4xf32>
    %106 = vector.broadcast %105 : vector<1x1x4xf32> to vector<8x8x4xf32>
    %107 = arith.mulf %106, %102 : vector<8x8x4xf32>
    %108 = arith.addf %98, %107 : vector<8x8x4xf32>
    %c0_41 = arith.constant 0 : index
    %c0_42 = arith.constant 0 : index
    %109 = vector.load %arg5[%c0_41, %c0_42] : memref<1x4xf32, #tpu.memory_space<vmem>>, vector<1x4xf32>
    %110 = vector.shape_cast %109 : vector<1x4xf32> to vector<4xf32>
    %111 = vector.shape_cast %110 : vector<4xf32> to vector<1x1x4xf32>
    %112 = vector.broadcast %111 : vector<1x1x4xf32> to vector<8x8x4xf32>
    %113 = arith.addf %108, %112 : vector<8x8x4xf32>
    %cst_43 = arith.constant 0.000000e+00 : f32
    %114 = vector.broadcast %cst_43 : f32 to vector<8x8x4xf32>
    %115 = arith.maximumf %113, %114 : vector<8x8x4xf32>
    %116 = vector.shape_cast %115 : vector<8x8x4xf32> to vector<64x4xf32>
    %c0_44 = arith.constant 0 : index
    %c0_45 = arith.constant 0 : index
    %117 = vector.load %arg6[%c0_44, %c0_45] : memref<4x16xf32, #tpu.memory_space<vmem>>, vector<4x16xf32>
    %cst_46 = arith.constant dense<0.000000e+00> : vector<64x16xf32>
    %118 = tpu.matmul %116, %117, %cst_46 {dimension_numbers = #tpu.dot_dimension_numbers<[1], [0], [0], [1], [0, 0, 1, 1], [], []>} : vector<64x4xf32>, vector<4x16xf32>, vector<64x16xf32> -> vector<64x16xf32>
    %c0_47 = arith.constant 0 : index
    %c0_48 = arith.constant 0 : index
    %119 = vector.load %arg7[%c0_47, %c0_48] : memref<1x16xf32, #tpu.memory_space<vmem>>, vector<1x16xf32>
    %120 = vector.broadcast %119 : vector<1x16xf32> to vector<64x16xf32>
    %121 = arith.addf %118, %120 : vector<64x16xf32>
    %cst_49 = arith.constant 0.000000e+00 : f32
    %122 = vector.broadcast %cst_49 : f32 to vector<64x16xf32>
    %123 = arith.maximumf %121, %122 : vector<64x16xf32>
    %c0_50 = arith.constant 0 : index
    %c0_51 = arith.constant 0 : index
    %c0_52 = arith.constant 0 : index
    %124 = vector.load %arg8[%c0_50, %c0_51, %c0_52] : memref<1x64x24xf32, #tpu.memory_space<vmem>>, vector<1x64x16xf32>
    %125 = vector.shape_cast %124 : vector<1x64x16xf32> to vector<64x16xf32>
    %126 = vector.shape_cast %123 : vector<64x16xf32> to vector<1x64x16xf32>
    tpu.vector_store %arg8[%c0_50, %c0_51, %c0_52], %126 {strides = array<i32>} : memref<1x64x24xf32, #tpu.memory_space<vmem>>, vector<1x64x16xf32>,
    %c0_53 = arith.constant 0 : index
    %c0_54 = arith.constant 0 : index
    %c0_55 = arith.constant 0 : index
    %127 = tpu.strided_load %arg10[%c0_53, %c0_54, %c0_55] {strides = array<i32: 1, 2, 1>} : memref<18x18x8xf32, #tpu.memory_space<vmem>>, vector<18x8x8xf32>
    %128 = vector.extract_strided_slice %127 {offsets = [0, 0, 0], sizes = [16, 8, 8], strides = [1, 1, 1]} : vector<18x8x8xf32> to vector<16x8x8xf32>
    %129 = vector.shape_cast %128 : vector<16x8x8xf32> to vector<8x2x8x8xf32>
    %130 = vector.extract_strided_slice %129 {offsets = [0, 0, 0, 0], sizes = [8, 1, 8, 8], strides = [1, 1, 1, 1]} : vector<8x2x8x8xf32> to vector<8x1x8x8xf32>
    %131 = vector.shape_cast %130 : vector<8x1x8x8xf32> to vector<8x8x8xf32>
    %132 = vector.extract_strided_slice %127 {offsets = [1, 0, 0], sizes = [16, 8, 8], strides = [1, 1, 1]} : vector<18x8x8xf32> to vector<16x8x8xf32>
    %133 = vector.shape_cast %132 : vector<16x8x8xf32> to vector<8x2x8x8xf32>
    %134 = vector.extract_strided_slice %133 {offsets = [0, 0, 0, 0], sizes = [8, 1, 8, 8], strides = [1, 1, 1, 1]} : vector<8x2x8x8xf32> to vector<8x1x8x8xf32>
    %135 = vector.shape_cast %134 : vector<8x1x8x8xf32> to vector<8x8x8xf32>
    %136 = arith.addf %131, %135 : vector<8x8x8xf32>
    %137 = vector.extract_strided_slice %127 {offsets = [2, 0, 0], sizes = [16, 8, 8], strides = [1, 1, 1]} : vector<18x8x8xf32> to vector<16x8x8xf32>
    %138 = vector.shape_cast %137 : vector<16x8x8xf32> to vector<8x2x8x8xf32>
    %139 = vector.extract_strided_slice %138 {offsets = [0, 0, 0, 0], sizes = [8, 1, 8, 8], strides = [1, 1, 1, 1]} : vector<8x2x8x8xf32> to vector<8x1x8x8xf32>
    %140 = vector.shape_cast %139 : vector<8x1x8x8xf32> to vector<8x8x8xf32>
    %141 = arith.addf %136, %140 : vector<8x8x8xf32>
    %c0_56 = arith.constant 0 : index
    %c1_57 = arith.constant 1 : index
    %c0_58 = arith.constant 0 : index
    %142 = tpu.strided_load %arg10[%c0_56, %c1_57, %c0_58] {strides = array<i32: 1, 2, 1>} : memref<18x18x8xf32, #tpu.memory_space<vmem>>, vector<18x8x8xf32>
    %143 = vector.extract_strided_slice %142 {offsets = [0, 0, 0], sizes = [16, 8, 8], strides = [1, 1, 1]} : vector<18x8x8xf32> to vector<16x8x8xf32>
    %144 = vector.shape_cast %143 : vector<16x8x8xf32> to vector<8x2x8x8xf32>
    %145 = vector.extract_strided_slice %144 {offsets = [0, 0, 0, 0], sizes = [8, 1, 8, 8], strides = [1, 1, 1, 1]} : vector<8x2x8x8xf32> to vector<8x1x8x8xf32>
    %146 = vector.shape_cast %145 : vector<8x1x8x8xf32> to vector<8x8x8xf32>
    %147 = arith.addf %141, %146 : vector<8x8x8xf32>
    %148 = vector.extract_strided_slice %142 {offsets = [1, 0, 0], sizes = [16, 8, 8], strides = [1, 1, 1]} : vector<18x8x8xf32> to vector<16x8x8xf32>
    %149 = vector.shape_cast %148 : vector<16x8x8xf32> to vector<8x2x8x8xf32>
    %150 = vector.extract_strided_slice %149 {offsets = [0, 0, 0, 0], sizes = [8, 1, 8, 8], strides = [1, 1, 1, 1]} : vector<8x2x8x8xf32> to vector<8x1x8x8xf32>
    %151 = vector.shape_cast %150 : vector<8x1x8x8xf32> to vector<8x8x8xf32>
    %152 = arith.addf %147, %151 : vector<8x8x8xf32>
    %153 = vector.extract_strided_slice %142 {offsets = [2, 0, 0], sizes = [16, 8, 8], strides = [1, 1, 1]} : vector<18x8x8xf32> to vector<16x8x8xf32>
    %154 = vector.shape_cast %153 : vector<16x8x8xf32> to vector<8x2x8x8xf32>
    %155 = vector.extract_strided_slice %154 {offsets = [0, 0, 0, 0], sizes = [8, 1, 8, 8], strides = [1, 1, 1, 1]} : vector<8x2x8x8xf32> to vector<8x1x8x8xf32>
    %156 = vector.shape_cast %155 : vector<8x1x8x8xf32> to vector<8x8x8xf32>
    %157 = arith.addf %152, %156 : vector<8x8x8xf32>
    %c0_59 = arith.constant 0 : index
    %c2_60 = arith.constant 2 : index
    %c0_61 = arith.constant 0 : index
    %158 = tpu.strided_load %arg10[%c0_59, %c2_60, %c0_61] {strides = array<i32: 1, 2, 1>} : memref<18x18x8xf32, #tpu.memory_space<vmem>>, vector<18x8x8xf32>
    %159 = vector.extract_strided_slice %158 {offsets = [0, 0, 0], sizes = [16, 8, 8], strides = [1, 1, 1]} : vector<18x8x8xf32> to vector<16x8x8xf32>
    %160 = vector.shape_cast %159 : vector<16x8x8xf32> to vector<8x2x8x8xf32>
    %161 = vector.extract_strided_slice %160 {offsets = [0, 0, 0, 0], sizes = [8, 1, 8, 8], strides = [1, 1, 1, 1]} : vector<8x2x8x8xf32> to vector<8x1x8x8xf32>
    %162 = vector.shape_cast %161 : vector<8x1x8x8xf32> to vector<8x8x8xf32>
    %163 = arith.addf %157, %162 : vector<8x8x8xf32>
    %164 = vector.extract_strided_slice %158 {offsets = [1, 0, 0], sizes = [16, 8, 8], strides = [1, 1, 1]} : vector<18x8x8xf32> to vector<16x8x8xf32>
    %165 = vector.shape_cast %164 : vector<16x8x8xf32> to vector<8x2x8x8xf32>
    %166 = vector.extract_strided_slice %165 {offsets = [0, 0, 0, 0], sizes = [8, 1, 8, 8], strides = [1, 1, 1, 1]} : vector<8x2x8x8xf32> to vector<8x1x8x8xf32>
    %167 = vector.shape_cast %166 : vector<8x1x8x8xf32> to vector<8x8x8xf32>
    %168 = arith.addf %163, %167 : vector<8x8x8xf32>
    %169 = vector.extract_strided_slice %158 {offsets = [2, 0, 0], sizes = [16, 8, 8], strides = [1, 1, 1]} : vector<18x8x8xf32> to vector<16x8x8xf32>
    %170 = vector.shape_cast %169 : vector<16x8x8xf32> to vector<8x2x8x8xf32>
    %171 = vector.extract_strided_slice %170 {offsets = [0, 0, 0, 0], sizes = [8, 1, 8, 8], strides = [1, 1, 1, 1]} : vector<8x2x8x8xf32> to vector<8x1x8x8xf32>
    %172 = vector.shape_cast %171 : vector<8x1x8x8xf32> to vector<8x8x8xf32>
    %173 = arith.addf %168, %172 : vector<8x8x8xf32>
    %cst_62 = arith.constant 0.111111112 : f32
    %174 = vector.broadcast %cst_62 : f32 to vector<8x8x8xf32>
    %175 = arith.mulf %173, %174 : vector<8x8x8xf32>
    %176 = vector.shape_cast %175 : vector<8x8x8xf32> to vector<64x8xf32>
    %cst_63 = arith.constant 0.000000e+00 : f32
    %177 = vector.broadcast %cst_63 : f32 to vector<64x8xf32>
    %178 = arith.maximumf %176, %177 : vector<64x8xf32>
    %c0_64 = arith.constant 0 : index
    %c0_65 = arith.constant 0 : index
    %c16 = arith.constant 16 : index
    %179 = vector.load %arg8[%c0_64, %c0_65, %c16] : memref<1x64x24xf32, #tpu.memory_space<vmem>>, vector<1x64x8xf32>
    %180 = vector.shape_cast %179 : vector<1x64x8xf32> to vector<64x8xf32>
    %181 = vector.shape_cast %178 : vector<64x8xf32> to vector<1x64x8xf32>
    tpu.vector_store %arg8[%c0_64, %c0_65, %c16], %181 {strides = array<i32>} : memref<1x64x24xf32, #tpu.memory_space<vmem>>, vector<1x64x8xf32>,
    return
  }
  func.func @transform_0(%arg0: i32) -> (i32, i32, i32, i32) {
    %c0_i32 = arith.constant 0 : i32
    %c0_i32_0 = arith.constant 0 : i32
    %c0_i32_1 = arith.constant 0 : i32
    %c0_i32_2 = arith.constant 0 : i32
    return %arg0, %c0_i32, %c0_i32_0, %c0_i32_1 : i32, i32, i32, i32
  }
  func.func @transform_1(%arg0: i32) -> (i32, i32) {
    %c0_i32 = arith.constant 0 : i32
    %c0_i32_0 = arith.constant 0 : i32
    %c0_i32_1 = arith.constant 0 : i32
    return %c0_i32, %c0_i32_0 : i32, i32
  }
  func.func @transform_2(%arg0: i32) -> (i32, i32) {
    %c0_i32 = arith.constant 0 : i32
    %c0_i32_0 = arith.constant 0 : i32
    %c0_i32_1 = arith.constant 0 : i32
    return %c0_i32, %c0_i32_0 : i32, i32
  }
  func.func @transform_3(%arg0: i32) -> (i32, i32) {
    %c0_i32 = arith.constant 0 : i32
    %c0_i32_0 = arith.constant 0 : i32
    %c0_i32_1 = arith.constant 0 : i32
    return %c0_i32, %c0_i32_0 : i32, i32
  }
  func.func @transform_4(%arg0: i32) -> (i32, i32) {
    %c0_i32 = arith.constant 0 : i32
    %c0_i32_0 = arith.constant 0 : i32
    %c0_i32_1 = arith.constant 0 : i32
    return %c0_i32, %c0_i32_0 : i32, i32
  }
  func.func @transform_5(%arg0: i32) -> (i32, i32) {
    %c0_i32 = arith.constant 0 : i32
    %c0_i32_0 = arith.constant 0 : i32
    %c0_i32_1 = arith.constant 0 : i32
    return %c0_i32, %c0_i32_0 : i32, i32
  }
  func.func @transform_6(%arg0: i32) -> (i32, i32) {
    %c0_i32 = arith.constant 0 : i32
    %c0_i32_0 = arith.constant 0 : i32
    %c0_i32_1 = arith.constant 0 : i32
    return %c0_i32, %c0_i32_0 : i32, i32
  }
  func.func @transform_7(%arg0: i32) -> (i32, i32, i32) {
    %c0_i32 = arith.constant 0 : i32
    %c0_i32_0 = arith.constant 0 : i32
    %c0_i32_1 = arith.constant 0 : i32
    return %arg0, %c0_i32, %c0_i32_0 : i32, i32, i32
  }
}

</mosaic_0001>

<bundles_post_ra>
// kernel: tpu_custom_call.1
= control target key start
LH: loop header
LB: loop body
LE: loop exit
PB: predicated region body
PF: predicated region fallthrough
CT: control target
= control target key end

     0   :  { %s1507_s24 = smov 0   ;;  %s2213_s0 = inlined_call_operand.vmem [shape: f32[2,16,16,8], index: 0, kind: input, shape index: {}]   ;;  %s2214_s1 = inlined_call_operand.vmem [shape: f32[8,4], index: 1, kind: input, shape index: {}]   ;;  %s2215_s2 = inlined_call_operand.vmem [shape: f32[1,4], index: 2, kind: input, shape index: {}]   ;;  %s2216_s3 = inlined_call_operand.vmem [shape: f32[9,4], index: 3, kind: input, shape index: {}]   ;;  %s2217_s4 = inlined_call_operand.vmem [shape: f32[1,4], index: 4, kind: input, shape index: {}]   ;;  %s2218_s5 = inlined_call_operand.vmem [shape: f32[4,16], index: 5, kind: input, shape index: {}]   ;;  %s2219_s6 = inlined_call_operand.vmem [shape: f32[1,16], index: 6, kind: input, shape index: {}]   ;;  %s2220_s7 = inlined_call_operand.vmem [shape: f32[2,64,24], index: 7, kind: output, shape index: {}]  }
   0x1 LB: > { %s1378_s25 = sadd.s32 4294967295, %s1463_s24   ;;  %p1382_p0 = scmp.ge.s32.totalorder %s1463_s24, 1  ;;  %s1463_s24 = sphi %s1507_s24, %s17_s24  }
   0x2   : > { %p237_p1 = scmp.lt.s32.totalorder %s1463_s24, 3 }
   0x4   : > { %p238_p2 = pnand %p1382_p0, %p237_p1 }
   0x5   : > { %p269_p3 = scmp.lt.s32.totalorder (!%p238_p2), %s1378_s25, 1  ;;  %s1466_s12 = smov (!%p238_p2), 16  }
   0x6   : > { %241 = sbr.rel (%p238_p2) target bundleno = 419 (0x1a3), region = 48 }
   0xb   : > { %v311_v0 = vld [vmem:[%s2214_s1] sm:$0xff]  ;;  %vm316_vm0 = vcmask 64512   ;;  %v1465_v1 = vmov 0.0   ;;  %s2222_s25 = smov (!%p269_p3, %s1378_s25), 1  ;;  %vm649_vm1 = vcmask 58368   ;;  %vm558_vm2 = vcmask 31744  }
   0xc   : > { %428 = vmatpush.msra.mxu0 %v311_v0  ;;  %1433 = vmatpush.msra.mxu2 %v311_v0  ;;  %651 = vst.msk [vmem:[#allocation3 + $0x18] sm:$0xff] %vm316_vm0, %v1465_v1  ;;  %s1430_s28 = sshll.u32 %s2222_s25, 8  ;;  %v1817_v34 = vld [vmem:[%s2215_s2] ss:$0 sm:$0xff]  ;;  %vm561_vm3 = vcmask 25600   ;;  %vm1039_vm4 = vcmask 1043456  }
   0xd   : > { %1434 = vmatpush.msra.mxu3 %v311_v0  ;;  %652 = vst.msk [vmem:[#allocation3 + $0x20] sm:$0xff] %vm316_vm0, %v1465_v1  ;;  %1432 = vmatpush.msra.mxu1 %v311_v0  ;;  %s1532_s8 = scalar_lea.vmem %s2213_s0, %s1430_s28  ;;  %s1431_s15 = sshll.u32 %s2222_s25, 6  ;;  %vm1092_vm5 = vcmask 130048   ;;  %vm1314_vm6 = vcmask 195712  }
   0xe   : > { %647 = vst.msk [vmem:[#allocation3] sm:$0xff] %vm316_vm0, %v1465_v1  ;;  %v279_v2 = vld [vmem:[%s1532_s8] sm:$0xff]  ;;  %v301_v4 = vld [vmem:[%s1532_s8 + $0xb0] sm:$0xff]  ;;  %v280_v6 = vld [vmem:[%s1532_s8 + $0x8] sm:$0xff]  ;;  %s2176_s18 = scalar_lea.vmem %s2220_s7, %s1431_s15 }
   0xf   : > { %648 = vst.msk [vmem:[#allocation3 + $0x8] sm:$0xff] %vm316_vm0, %v1465_v1  ;;  %v291_v3 = vld [vmem:[%s1532_s8 + $0x60] sm:$0xff]  ;;  %1387 = vmatmul.msk.f32.vlgmr.msra.gmra.mxu0 %vm316_vm0, %v279_v2  ;;  %1409 = vmatmul.msk.f32.vlgmr.msra.gmra.mxu3 %vm316_vm0, %v301_v4  ;;  %v1548_v5 = vld [vmem:[%s1532_s8 + $0x50] sm:$0xff]  ;;  %v1562_v7 = vld [vmem:[%s1532_s8 + $0x68] sm:$0xff] }
  0x10   : > { %654 = vst.msk [vmem:[#allocation3 + $0x30] sm:$0xff] %vm316_vm0, %v1465_v1  ;;  %1399 = vmatmul.msk.f32.vlgmr.msra.gmra.mxu2 %vm316_vm0, %v291_v3  ;;  %1397 = vmatmul.msk.f32.vlgmr.msra.gmra.mxu1 %vm316_vm0, %v1548_v5  ;;  %v1567_v8 = vld [vmem:[%s1532_s8 + $0xb8] sm:$0xff]  ;;  %v1594_v10 = vld [vmem:[%s1532_s8 + $0x10] sm:$0xff]  ;;  %v1602_v12 = vld [vmem:[%s1532_s8 + $0xc0] sm:$0xff] }
  0x11   : > { %655 = vst.msk [vmem:[#allocation3 + $0x38] sm:$0xff] %vm316_vm0, %v1465_v1  ;;  %v1572_v9 = vld [vmem:[%s1532_s8 + $0x58] sm:$0xff]  ;;  %v1597_v11 = vld [vmem:[%s1532_s8 + $0x70] sm:$0xff]  ;;  %v1633_v15 = vld [vmem:[%s1532_s8 + $0xc8] sm:$0xff] }
  0x12   : > { %703 = vst.msk [vmem:[#allocation3 + $0x19] sm:$0xff] %vm316_vm0, %v279_v2  ;;  %v1625_v13 = vld [vmem:[%s1532_s8 + $0x18] sm:$0xff]  ;;  %v283_v16 = vld [vmem:[%s1532_s8 + $0x20] sm:$0xff]  ;;  %v305_v18 = vld [vmem:[%s1532_s8 + $0xd0] sm:$0xff] }
  0x13   : > { %657 = vst.msk [vmem:[#allocation3 + $0x48] sm:$0xff] %vm316_vm0, %v1465_v1  ;;  %v1628_v14 = vld [vmem:[%s1532_s8 + $0x78] sm:$0xff]  ;;  %v295_v17 = vld [vmem:[%s1532_s8 + $0x80] sm:$0xff]  ;;  %v284_v19 = vld [vmem:[%s1532_s8 + $0x28] sm:$0xff] }
  0x14   : > { %658 = vst.msk [vmem:[#allocation3 + $0x50] sm:$0xff] %vm316_vm0, %v1465_v1  ;;  %v296_v20 = vld [vmem:[%s1532_s8 + $0x88] sm:$0xff]  ;;  %v306_v21 = vld [vmem:[%s1532_s8 + $0xd8] sm:$0xff]  ;;  %v285_v22 = vld [vmem:[%s1532_s8 + $0x30] sm:$0xff] }
  0x15   : > { %660 = vst.msk [vmem:[#allocation3 + $0x60] sm:$0xff] %vm316_vm0, %v1465_v1  ;;  %v297_v23 = vld [vmem:[%s1532_s8 + $0x90] sm:$0xff]  ;;  %v307_v24 = vld [vmem:[%s1532_s8 + $0xe0] sm:$0xff]  ;;  %v286_v25 = vld [vmem:[%s1532_s8 + $0x38] sm:$0xff] }
  0x16   : > { %661 = vst.msk [vmem:[#allocation3 + $0x68] sm:$0xff] %vm316_vm0, %v1465_v1  ;;  %v298_v26 = vld [vmem:[%s1532_s8 + $0x98] sm:$0xff]  ;;  %v308_v27 = vld [vmem:[%s1532_s8 + $0xe8] sm:$0xff]  ;;  %v287_v28 = vld [vmem:[%s1532_s8 + $0x40] sm:$0xff] }
  0x17   : > { %663 = vst.msk [vmem:[#allocation3 + $0x78] sm:$0xff] %vm316_vm0, %v1465_v1  ;;  %1388 = vmatmul.msk.f32.gmra.mxu0 %vm316_vm0, %v280_v6  ;;  %1410 = vmatmul.msk.f32.gmra.mxu3 %vm316_vm0, %v1567_v8  ;;  %v299_v29 = vld [vmem:[%s1532_s8 + $0xa0] sm:$0xff]  ;;  %v309_v30 = vld [vmem:[%s1532_s8 + $0xf0] sm:$0xff]  ;;  %v288_v31 = vld [vmem:[%s1532_s8 + $0x48] sm:$0xff] }
  0x18   : > { %664 = vst.msk [vmem:[#allocation3 + $0x80] sm:$0xff] %vm316_vm0, %v1465_v1  ;;  %1400 = vmatmul.msk.f32.gmra.mxu2 %vm316_vm0, %v1562_v7  ;;  %1398 = vmatmul.msk.f32.gmra.mxu1 %vm316_vm0, %v1572_v9  ;;  %v300_v32 = vld [vmem:[%s1532_s8 + $0xa8] sm:$0xff]  ;;  %v310_v33 = vld [vmem:[%s1532_s8 + $0xf8] sm:$0xff] }
  0x19   : > { %666 = vst.msk [vmem:[#allocation3 + $0x90] sm:$0xff] %vm316_vm0, %v1465_v1 }
  0x1a   : > { %667 = vst.msk [vmem:[#allocation3 + $0x98] sm:$0xff] %vm316_vm0, %v1465_v1 }
  0x1b   : > { %669 = vst.msk [vmem:[#allocation3 + $0xa8] sm:$0xff] %vm316_vm0, %v1465_v1 }
  0x1c   : > { %670 = vst.msk [vmem:[#allocation3 + $0xb0] sm:$0xff] %vm316_vm0, %v1465_v1 }
  0x1d   : > { %672 = vst.msk [vmem:[#allocation3 + $0xc0] sm:$0xff] %vm316_vm0, %v1465_v1 }
  0x1e   : > { %673 = vst.msk [vmem:[#allocation3 + $0xc8] sm:$0xff] %vm316_vm0, %v1465_v1 }
  0x1f   : > { %675 = vst.msk [vmem:[#allocation3 + $0xd8] sm:$0xff] %vm316_vm0, %v1465_v1  ;;  %1389 = vmatmul.msk.f32.gmra.mxu0 %vm316_vm0, %v1594_v10  ;;  %1411 = vmatmul.msk.f32.gmra.mxu3 %vm316_vm0, %v1602_v12 }
  0x20   : > { %676 = vst.msk [vmem:[#allocation3 + $0xe0] sm:$0xff] %vm316_vm0, %v1465_v1  ;;  %1401 = vmatmul.msk.f32.gmra.mxu2 %vm316_vm0, %v1597_v11 }
  0x21   : > { %678 = vst.msk [vmem:[#allocation3 + $0xf0] sm:$0xff] %vm316_vm0, %v1465_v1 }
  0x22   : > { %679 = vst.msk [vmem:[#allocation3 + $0xf8] sm:$0xff] %vm316_vm0, %v1465_v1 }
  0x23   : > { %681 = vst.msk [vmem:[#allocation3 + $0x108] sm:$0xff] %vm316_vm0, %v1465_v1 }
  0x24   : > { %682 = vst.msk [vmem:[#allocation3 + $0x110] sm:$0xff] %vm316_vm0, %v1465_v1 }
  0x25   : > { %684 = vst.msk [vmem:[#allocation3 + $0x120] sm:$0xff] %vm316_vm0, %v1465_v1 }
  0x26   : > { %685 = vst.msk [vmem:[#allocation3 + $0x128] sm:$0xff] %vm316_vm0, %v1465_v1 }
  0x27   : > { %687 = vst.msk [vmem:[#allocation3 + $0x138] sm:$0xff] %vm316_vm0, %v1465_v1  ;;  %1390 = vmatmul.msk.f32.gmra.mxu0 %vm316_vm0, %v1625_v13  ;;  %1412 = vmatmul.msk.f32.gmra.mxu3 %vm316_vm0, %v1633_v15 }
  0x28   : > { %688 = vst.msk [vmem:[#allocation3 + $0x140] sm:$0xff] %vm316_vm0, %v1465_v1  ;;  %1402 = vmatmul.msk.f32.gmra.mxu2 %vm316_vm0, %v1628_v14 }
  0x29   : > { %690 = vst.msk [vmem:[#allocation3 + $0x150] sm:$0xff] %vm316_vm0, %v1465_v1 }
  0x2a   : > { %691 = vst.msk [vmem:[#allocation3 + $0x158] sm:$0xff] %vm316_vm0, %v1465_v1 }
  0x2b   : > { %693 = vst.msk [vmem:[#allocation3 + $0x168] sm:$0xff] %vm316_vm0, %v1465_v1 }
  0x2c   : > { %694 = vst.msk [vmem:[#allocation3 + $0x170] sm:$0xff] %vm316_vm0, %v1465_v1 }
  0x2d   : > { %696 = vst.msk [vmem:[#allocation3 + $0x180] sm:$0xff] %vm316_vm0, %v1465_v1 }
  0x2e   : > { %697 = vst.msk [vmem:[#allocation3 + $0x188] sm:$0xff] %vm316_vm0, %v1465_v1 }
  0x2f   : > { %715 = vst.msk [vmem:[#allocation3 + $0xa9] sm:$0xff] %vm316_vm0, %v291_v3  ;;  %1391 = vmatmul.msk.f32.gmra.mxu0 %vm316_vm0, %v283_v16  ;;  %1413 = vmatmul.msk.f32.gmra.mxu3 %vm316_vm0, %v305_v18 }
  0x30   : > { %725 = vst.msk [vmem:[#allocation3 + $0x121] sm:$0xff] %vm316_vm0, %v301_v4  ;;  %1403 = vmatmul.msk.f32.gmra.mxu2 %vm316_vm0, %v295_v17  ;;  %v1010_v4 = vld [vmem:[%s2218_s5] sm:$0xf] }
  0x31   : > { %653 = vst.msk [vmem:[#allocation3 + $0x28] sm:$0x3] %vm649_vm1, %v1465_v1  ;;  %1419 = vmatpush.msk.msrb.mxu1 %vm1039_vm4, %v1010_v4 }
  0x32   : > { %704 = vst.msk [vmem:[#allocation3 + $0x21] sm:$0xff] %vm316_vm0, %v280_v6 }
  0x33   : > { %650 = vst.msk [vmem:[#allocation3 + $0x10] sm:$0x3] %vm649_vm1, %v1465_v1 }
  0x34   : > { %656 = vst.msk [vmem:[#allocation3 + $0x40] sm:$0x3] %vm649_vm1, %v1465_v1 }
  0x35   : > { %659 = vst.msk [vmem:[#allocation3 + $0x58] sm:$0x3] %vm649_vm1, %v1465_v1 }
  0x36   : > { %662 = vst.msk [vmem:[#allocation3 + $0x70] sm:$0x3] %vm649_vm1, %v1465_v1 }
  0x37   : > { %665 = vst.msk [vmem:[#allocation3 + $0x88] sm:$0x3] %vm649_vm1, %v1465_v1  ;;  %1392 = vmatmul.msk.f32.gmra.mxu0 %vm316_vm0, %v284_v19  ;;  %1414 = vmatmul.msk.f32.gmra.mxu3 %vm316_vm0, %v306_v21 }
  0x38   : > { %668 = vst.msk [vmem:[#allocation3 + $0xa0] sm:$0x3] %vm649_vm1, %v1465_v1  ;;  %1404 = vmatmul.msk.f32.gmra.mxu2 %vm316_vm0, %v296_v20 }
  0x39   : > { %671 = vst.msk [vmem:[#allocation3 + $0xb8] sm:$0x3] %vm649_vm1, %v1465_v1 }
  0x3a   : > { %674 = vst.msk [vmem:[#allocation3 + $0xd0] sm:$0x3] %vm649_vm1, %v1465_v1 }
  0x3b   : > { %677 = vst.msk [vmem:[#allocation3 + $0xe8] sm:$0x3] %vm649_vm1, %v1465_v1 }
  0x3c   : > { %680 = vst.msk [vmem:[#allocation3 + $0x100] sm:$0x3] %vm649_vm1, %v1465_v1 }
  0x3d   : > { %683 = vst.msk [vmem:[#allocation3 + $0x118] sm:$0x3] %vm649_vm1, %v1465_v1 }
  0x3e   : > { %686 = vst.msk [vmem:[#allocation3 + $0x130] sm:$0x3] %vm649_vm1, %v1465_v1 }
  0x3f   : > { %689 = vst.msk [vmem:[#allocation3 + $0x148] sm:$0x3] %vm649_vm1, %v1465_v1  ;;  %1393 = vmatmul.msk.f32.gmra.mxu0 %vm316_vm0, %v285_v22  ;;  %1415 = vmatmul.msk.f32.gmra.mxu3 %vm316_vm0, %v307_v24 }
  0x40   : > { %692 = vst.msk [vmem:[#allocation3 + $0x160] sm:$0x3] %vm649_vm1, %v1465_v1  ;;  %1405 = vmatmul.msk.f32.gmra.mxu2 %vm316_vm0, %v297_v23 }
  0x41   : > { %695 = vst.msk [vmem:[#allocation3 + $0x178] sm:$0x3] %vm649_vm1, %v1465_v1 }
  0x42   : > { %698 = vst.msk [vmem:[#allocation3 + $0x190] sm:$0x3] %vm649_vm1, %v1465_v1 }
  0x43   : > { %716 = vst.msk [vmem:[#allocation3 + $0xb1] sm:$0xff] %vm316_vm0, %v1562_v7 }
  0x44   : > { %726 = vst.msk [vmem:[#allocation3 + $0x129] sm:$0xff] %vm316_vm0, %v1567_v8 }
  0x45   : > { %705 = vst.msk [vmem:[#allocation3 + $0x31] sm:$0xff] %vm316_vm0, %v1594_v10 }
  0x46   : > { %713 = vst.msk [vmem:[#allocation3 + $0x91] sm:$0xff] %vm316_vm0, %v1548_v5 }
  0x47   : > { %717 = vst.msk [vmem:[#allocation3 + $0xc1] sm:$0xff] %vm316_vm0, %v1597_v11  ;;  %1394 = vmatmul.msk.f32.gmra.mxu0 %vm316_vm0, %v286_v25  ;;  %1416 = vmatmul.msk.f32.gmra.mxu3 %vm316_vm0, %v308_v27 }
  0x48   : > { %1406 = vmatmul.msk.f32.gmra.mxu2 %vm316_vm0, %v298_v26  ;;  %727 = vst.msk [vmem:[#allocation3 + $0x139] sm:$0xff] %vm316_vm0, %v1602_v12 }
  0x49   : > { %706 = vst.msk [vmem:[#allocation3 + $0x39] sm:$0xff] %vm316_vm0, %v1625_v13 }
  0x4a   : > { %714 = vst.msk [vmem:[#allocation3 + $0x99] sm:$0xff] %vm316_vm0, %v1572_v9 }
  0x4b   : > { %718 = vst.msk [vmem:[#allocation3 + $0xc9] sm:$0xff] %vm316_vm0, %v1628_v14 }
  0x4c   : > { %728 = vst.msk [vmem:[#allocation3 + $0x141] sm:$0xff] %vm316_vm0, %v1633_v15 }
  0x4d   : > { %707 = vst.msk [vmem:[#allocation3 + $0x49] sm:$0xff] %vm316_vm0, %v283_v16 }
  0x4e   : > { %719 = vst.msk [vmem:[#allocation3 + $0xd9] sm:$0xff] %vm316_vm0, %v295_v17  ;;  %v1903_v17 = vld [vmem:[%s2216_s3] ss:$0 sm:$0xff] }
  0x4f   : > { %729 = vst.msk [vmem:[#allocation3 + $0x151] sm:$0xff] %vm316_vm0, %v305_v18  ;;  %1395 = vmatmul.msk.f32.gmra.mxu0 %vm316_vm0, %v287_v28  ;;  %1417 = vmatmul.msk.f32.gmra.mxu3 %vm316_vm0, %v309_v30  ;;  %v1908_v18 = vld [vmem:[%s2216_s3 + $0x3] ss:$0 sm:$0xff] }
  0x50   : > { %1407 = vmatmul.msk.f32.gmra.mxu2 %vm316_vm0, %v299_v29  ;;  %708 = vst.msk [vmem:[#allocation3 + $0x51] sm:$0xff] %vm316_vm0, %v284_v19 }
  0x51   : > { %720 = vst.msk [vmem:[#allocation3 + $0xe1] sm:$0xff] %vm316_vm0, %v296_v20 }
  0x52   : > { %730 = vst.msk [vmem:[#allocation3 + $0x159] sm:$0xff] %vm316_vm0, %v306_v21 }
  0x53   : > { %709 = vst.msk [vmem:[#allocation3 + $0x61] sm:$0xff] %vm316_vm0, %v285_v22 }
  0x54   : > { %721 = vst.msk [vmem:[#allocation3 + $0xf1] sm:$0xff] %vm316_vm0, %v297_v23 }
  0x55   : > { %731 = vst.msk [vmem:[#allocation3 + $0x169] sm:$0xff] %vm316_vm0, %v307_v24 }
  0x56   : > { %710 = vst.msk [vmem:[#allocation3 + $0x69] sm:$0xff] %vm316_vm0, %v286_v25 }
  0x57   : > { %722 = vst.msk [vmem:[#allocation3 + $0xf9] sm:$0xff] %vm316_vm0, %v298_v26  ;;  %1396 = vmatmul.msk.f32.gmra.mxu0 %vm316_vm0, %v288_v31  ;;  %1418 = vmatmul.msk.f32.gmra.mxu3 %vm316_vm0, %v310_v33 }
  0x58   : > { %1408 = vmatmul.msk.f32.gmra.mxu2 %vm316_vm0, %v300_v32  ;;  %732 = vst.msk [vmem:[#allocation3 + $0x171] sm:$0xff] %vm316_vm0, %v308_v27 }
  0x59   : > { %711 = vst.msk [vmem:[#allocation3 + $0x79] sm:$0xff] %vm316_vm0, %v287_v28  ;;  %v1921_v28 = vld [vmem:[%s2216_s3 + $0x6] ss:$0 sm:$0xff] }
  0x5a   : > { %723 = vst.msk [vmem:[#allocation3 + $0x109] sm:$0xff] %vm316_vm0, %v299_v29 }
  0x5b   : > { %733 = vst.msk [vmem:[#allocation3 + $0x181] sm:$0xff] %vm316_vm0, %v309_v30 }
  0x5c   : > { %712 = vst.msk [vmem:[#allocation3 + $0x81] sm:$0xff] %vm316_vm0, %v288_v31 }
  0x5d   : > { %724 = vst.msk [vmem:[#allocation3 + $0x111] sm:$0xff] %vm316_vm0, %v300_v32 }
  0x5e   : > { %734 = vst.msk [vmem:[#allocation3 + $0x189] sm:$0xff] %vm316_vm0, %v310_v33  ;;  %v1927_v33 = vld [vmem:[%s2216_s3 + $0x1] ss:$0 sm:$0xff] }
  0x5f   : > { %563 = vst.msk [vmem:[#allocation2 + $0x18] sm:$0xff] %vm558_vm2, %v1465_v1 }
  0x60   : > { %564 = vst.msk [vmem:[#allocation2 + $0x20] sm:$0xff] %vm558_vm2, %v1465_v1 }
  0x61   : > { %559 = vst.msk [vmem:[#allocation2] sm:$0xff] %vm558_vm2, %v1465_v1 }
  0x62   : > { %560 = vst.msk [vmem:[#allocation2 + $0x8] sm:$0xff] %vm558_vm2, %v1465_v1 }
  0x63   : > { %566 = vst.msk [vmem:[#allocation2 + $0x30] sm:$0xff] %vm558_vm2, %v1465_v1 }
  0x64   : > { %567 = vst.msk [vmem:[#allocation2 + $0x38] sm:$0xff] %vm558_vm2, %v1465_v1 }
  0x65   : > { %569 = vst.msk [vmem:[#allocation2 + $0x48] sm:$0xff] %vm558_vm2, %v1465_v1 }
  0x66   : > { %570 = vst.msk [vmem:[#allocation2 + $0x50] sm:$0xff] %vm558_vm2, %v1465_v1 }
  0x67   : > { %572 = vst.msk [vmem:[#allocation2 + $0x60] sm:$0xff] %vm558_vm2, %v1465_v1 }
  0x68   : > { %573 = vst.msk [vmem:[#allocation2 + $0x68] sm:$0xff] %vm558_vm2, %v1465_v1 }
  0x69   : > { %575 = vst.msk [vmem:[#allocation2 + $0x78] sm:$0xff] %vm558_vm2, %v1465_v1  ;;  %v735_v19 = vld [vmem:[#allocation2] ss:$2 sm:$0xff]  ;;  %v815_v31 = vld [vmem:[#allocation2 + $0x1] ss:$2 sm:$0xff] }
  0x6a   : > { %576 = vst.msk [vmem:[#allocation2 + $0x80] sm:$0xff] %vm558_vm2, %v1465_v1  ;;  %v770_v26 = vmul.f32 %v1903_v17, %v735_v19 }
  0x6b   : > { %578 = vst.msk [vmem:[#allocation2 + $0x90] sm:$0xff] %vm558_vm2, %v1465_v1 }
  0x6c   : > { %579 = vst.msk [vmem:[#allocation2 + $0x98] sm:$0xff] %vm558_vm2, %v1465_v1 }
  0x6d   : > { %581 = vst.msk [vmem:[#allocation2 + $0xa8] sm:$0xff] %vm558_vm2, %v1465_v1 }
  0x6e   : > { %582 = vst.msk [vmem:[#allocation2 + $0xb0] sm:$0xff] %vm558_vm2, %v1465_v1 }
  0x6f   : > { %584 = vst.msk [vmem:[#allocation2 + $0xc0] sm:$0xff] %vm558_vm2, %v1465_v1 }
  0x70   : > { %585 = vst.msk [vmem:[#allocation2 + $0xc8] sm:$0xff] %vm558_vm2, %v1465_v1 }
  0x71   : > { %587 = vst.msk [vmem:[#allocation2 + $0xd8] sm:$0xff] %vm558_vm2, %v1465_v1 }
  0x72   : > { %588 = vst.msk [vmem:[#allocation2 + $0xe0] sm:$0xff] %vm558_vm2, %v1465_v1 }
  0x73   : > { %590 = vst.msk [vmem:[#allocation2 + $0xf0] sm:$0xff] %vm558_vm2, %v1465_v1 }
  0x74   : > { %591 = vst.msk [vmem:[#allocation2 + $0xf8] sm:$0xff] %vm558_vm2, %v1465_v1 }
  0x75   : > { %593 = vst.msk [vmem:[#allocation2 + $0x108] sm:$0xff] %vm558_vm2, %v1465_v1 }
  0x76   : > { %594 = vst.msk [vmem:[#allocation2 + $0x110] sm:$0xff] %vm558_vm2, %v1465_v1 }
  0x77   : > { %596 = vst.msk [vmem:[#allocation2 + $0x120] sm:$0xff] %vm558_vm2, %v1465_v1 }
  0x78   : > { %597 = vst.msk [vmem:[#allocation2 + $0x128] sm:$0xff] %vm558_vm2, %v1465_v1 }
  0x79   : > { %599 = vst.msk [vmem:[#allocation2 + $0x138] sm:$0xff] %vm558_vm2, %v1465_v1 }
  0x7a   : > { %600 = vst.msk [vmem:[#allocation2 + $0x140] sm:$0xff] %vm558_vm2, %v1465_v1 }
  0x7b   : > { %602 = vst.msk [vmem:[#allocation2 + $0x150] sm:$0xff] %vm558_vm2, %v1465_v1 }
  0x7c   : > { %603 = vst.msk [vmem:[#allocation2 + $0x158] sm:$0xff] %vm558_vm2, %v1465_v1 }
  0x7d   : > { %605 = vst.msk [vmem:[#allocation2 + $0x168] sm:$0xff] %vm558_vm2, %v1465_v1 }
  0x7e   : > { %606 = vst.msk [vmem:[#allocation2 + $0x170] sm:$0xff] %vm558_vm2, %v1465_v1 }
  0x7f   : > { %608 = vst.msk [vmem:[#allocation2 + $0x180] sm:$0xff] %vm558_vm2, %v1465_v1 }
  0x80   : > { %609 = vst.msk [vmem:[#allocation2 + $0x188] sm:$0xff] %vm558_vm2, %v1465_v1 }
  0x81   : > { %565 = vst.msk [vmem:[#allocation2 + $0x28] sm:$0x3] %vm561_vm3, %v1465_v1 }
  0x82   : > { %562 = vst.msk [vmem:[#allocation2 + $0x10] sm:$0x3] %vm561_vm3, %v1465_v1 }
  0x83   : > { %568 = vst.msk [vmem:[#allocation2 + $0x40] sm:$0x3] %vm561_vm3, %v1465_v1 }
  0x84   : > { %571 = vst.msk [vmem:[#allocation2 + $0x58] sm:$0x3] %vm561_vm3, %v1465_v1 }
  0x85   : > { %574 = vst.msk [vmem:[#allocation2 + $0x70] sm:$0x3] %vm561_vm3, %v1465_v1 }
  0x86   : > { %577 = vst.msk [vmem:[#allocation2 + $0x88] sm:$0x3] %vm561_vm3, %v1465_v1 }
  0x87   : > { %580 = vst.msk [vmem:[#allocation2 + $0xa0] sm:$0x3] %vm561_vm3, %v1465_v1 }
  0x88   : > { %583 = vst.msk [vmem:[#allocation2 + $0xb8] sm:$0x3] %vm561_vm3, %v1465_v1 }
  0x89   : > { %586 = vst.msk [vmem:[#allocation2 + $0xd0] sm:$0x3] %vm561_vm3, %v1465_v1 }
  0x8a   : > { %589 = vst.msk [vmem:[#allocation2 + $0xe8] sm:$0x3] %vm561_vm3, %v1465_v1 }
  0x8b   : > { %592 = vst.msk [vmem:[#allocation2 + $0x100] sm:$0x3] %vm561_vm3, %v1465_v1 }
  0x8c   : > { %v430_v35 = vpop.f32.mrf.mxu0  ;;  %595 = vst.msk [vmem:[#allocation2 + $0x118] sm:$0x3] %vm561_vm3, %v1465_v1 }
  0x8d   : > { %v431_v36 = vadd.f32 %v1817_v34, %v430_v35  ;;  %v460_v50 = vpop.f32.mrf.mxu1  ;;  %598 = vst.msk [vmem:[#allocation2 + $0x130] sm:$0x3] %vm561_vm3, %v1465_v1 }
  0x8e   : > { %601 = vst.msk [vmem:[#allocation2 + $0x148] sm:$0x3] %vm561_vm3, %v1465_v1  ;;  %v461_v57 = vadd.f32 %v1817_v34, %v460_v50 }
  0x8f   : > { %v526_v37 = vmax.f32 %v431_v36, 0.0  ;;  %604 = vst.msk [vmem:[#allocation2 + $0x160] sm:$0x3] %vm561_vm3, %v1465_v1 }
  0x90   : > { %607 = vst.msk [vmem:[#allocation2 + $0x178] sm:$0x3] %vm561_vm3, %v1465_v1  ;;  %v536_v2 = vmax.f32 %v461_v57, 0.0 }
  0x91   : > { %615 = vst.msk [vmem:[#allocation2 + $0x19] sm:$0xff] %vm558_vm2, %v526_v37 }
  0x92   : > { %v496_v40 = vpop.f32.mrf.mxu3  ;;  %610 = vst.msk [vmem:[#allocation2 + $0x190] sm:$0x3] %vm561_vm3, %v1465_v1 }
  0x93   : > { %v466_v38 = vpop.f32.mrf.mxu2  ;;  %v497_v41 = vadd.f32 %v1817_v34, %v496_v40  ;;  %625 = vst.msk [vmem:[#allocation2 + $0x91] sm:$0xff] %vm558_vm2, %v536_v2  ;;  %v1939_v40 = vld [vmem:[%s2216_s3 + $0x4] ss:$0 sm:$0xff] }
  0x94   : > { %v467_v39 = vadd.f32 %v1817_v34, %v466_v38  ;;  %v433_v42 = vpop.f32.mrf.mxu0 }
  0x95   : > { %v434_v44 = vadd.f32 %v1817_v34, %v433_v42  ;;  %v548_v45 = vmax.f32 %v497_v41, 0.0  ;;  %v463_v60 = vpop.f32.mrf.mxu1 }
  0x96   : > { %v538_v43 = vmax.f32 %v467_v39, 0.0  ;;  %v464_v3 = vadd.f32 %v1817_v34, %v463_v60  ;;  %v850_v39 = vmul.f32 %v1927_v33, %v815_v31  ;;  %v1964_v60 = vld [vmem:[%s2216_s3 + $0x5] ss:$0 sm:$0xff] }
  0x97   : > { %v527_v46 = vmax.f32 %v434_v44, 0.0  ;;  %637 = vst.msk [vmem:[#allocation2 + $0x121] sm:$0xff] %vm558_vm2, %v548_v45  ;;  %v1945_v44 = vld [vmem:[%s2216_s3 + $0x7] ss:$0 sm:$0xff] }
  0x98   : > { %627 = vst.msk [vmem:[#allocation2 + $0xa9] sm:$0xff] %vm558_vm2, %v538_v43  ;;  %v537_v12 = vmax.f32 %v464_v3, 0.0 }
  0x99   : > { %616 = vst.msk [vmem:[#allocation2 + $0x21] sm:$0xff] %vm558_vm2, %v527_v46 }
  0x9a   : > { %v499_v48 = vpop.f32.mrf.mxu3  ;;  %626 = vst.msk [vmem:[#allocation2 + $0x99] sm:$0xff] %vm558_vm2, %v537_v12 }
  0x9b   : > { %v469_v47 = vpop.f32.mrf.mxu2  ;;  %v500_v53 = vadd.f32 %v1817_v34, %v499_v48  ;;  %v903_v48 = vld [vmem:[#allocation2 + $0x2] ss:$2 sm:$0xff] }
  0x9c   : > { %v436_v49 = vpop.f32.mrf.mxu0  ;;  %v470_v51 = vadd.f32 %v1817_v34, %v469_v47 }
  0x9d   : > { %v437_v55 = vadd.f32 %v1817_v34, %v436_v49  ;;  %v549_v61 = vmax.f32 %v500_v53, 0.0  ;;  %v1955_v53 = vld [vmem:[%s2216_s3 + $0x2] ss:$0 sm:$0xff] }
  0x9e   : > { %v539_v58 = vmax.f32 %v470_v51, 0.0 }
  0x9f   : > { %v528_v63 = vmax.f32 %v437_v55, 0.0  ;;  %638 = vst.msk [vmem:[#allocation2 + $0x129] sm:$0xff] %vm558_vm2, %v549_v61 }
  0xa0   : > { %628 = vst.msk [vmem:[#allocation2 + $0xb1] sm:$0xff] %vm558_vm2, %v539_v58  ;;  %v737_v20 = vld [vmem:[#allocation2 + $0x18] ss:$2 sm:$0xff]  ;;  %v817_v41 = vld [vmem:[#allocation2 + $0x19] ss:$2 sm:$0xff] }
  0xa1   : > { %617 = vst.msk [vmem:[#allocation2 + $0x31] sm:$0xff] %vm558_vm2, %v528_v63  ;;  %v780_v27 = vmul.f32 %v1908_v18, %v737_v20 }
  0xa2   : > { %v502_v54 = vpop.f32.mrf.mxu3 }
  0xa3   : > { %v472_v52 = vpop.f32.mrf.mxu2  ;;  %v503_v62 = vadd.f32 %v1817_v34, %v502_v54  ;;  %v788_v37 = vadd.f32 %v780_v27, %v770_v26 }
  0xa4   : > { %v439_v56 = vpop.f32.mrf.mxu0  ;;  %v473_v59 = vadd.f32 %v1817_v34, %v472_v52  ;;  %v868_v52 = vmul.f32 %v1939_v40, %v817_v41 }
  0xa5   : > { %v440_v0 = vadd.f32 %v1817_v34, %v439_v56  ;;  %v550_v7 = vmax.f32 %v503_v62, 0.0  ;;  %v905_v62 = vld [vmem:[#allocation2 + $0x1a] ss:$2 sm:$0xff] }
  0xa6   : > { %v540_v5 = vmax.f32 %v473_v59, 0.0  ;;  %v938_v59 = vmul.f32 %v1955_v53, %v903_v48  ;;  %v1973_v2 = vld [vmem:[#allocation2 + $0x120] ss:$2 sm:$0xff] }
  0xa7   : > { %v529_v9 = vmax.f32 %v440_v0, 0.0  ;;  %639 = vst.msk [vmem:[#allocation2 + $0x139] sm:$0xff] %vm558_vm2, %v550_v7  ;;  %v1971_v0 = vld [vmem:[%s2216_s3 + $0x8] ss:$0 sm:$0xff]  ;;  %v956_v7 = vmul.f32 %v1964_v60, %v905_v62 }
  0xa8   : > { %629 = vst.msk [vmem:[#allocation2 + $0xc1] sm:$0xff] %vm558_vm2, %v540_v5  ;;  %v2010_v48 = vld [vmem:[#allocation2 + $0x122] ss:$2 sm:$0xff] }
  0xa9   : > { %618 = vst.msk [vmem:[#allocation2 + $0x39] sm:$0xff] %vm558_vm2, %v529_v9  ;;  %v776_v9 = vmul.f32 %v1903_v17, %v1973_v2 }
  0xaa   : > { %v505_v8 = vpop.f32.mrf.mxu3 }
  0xab   : > { %v475_v6 = vpop.f32.mrf.mxu2  ;;  %v506_v10 = vadd.f32 %v1817_v34, %v505_v8 }
  0xac   : > { %v476_v1 = vadd.f32 %v1817_v34, %v475_v6  ;;  %v442_v11 = vpop.f32.mrf.mxu0 }
  0xad   : > { %v443_v13 = vadd.f32 %v1817_v34, %v442_v11  ;;  %v551_v15 = vmax.f32 %v506_v10, 0.0 }
  0xae   : > { %v541_v14 = vmax.f32 %v476_v1, 0.0 }
  0xaf   : > { %v530_v16 = vmax.f32 %v443_v13, 0.0  ;;  %640 = vst.msk [vmem:[#allocation2 + $0x141] sm:$0xff] %vm558_vm2, %v551_v15 }
  0xb0   : > { %630 = vst.msk [vmem:[#allocation2 + $0xc9] sm:$0xff] %vm558_vm2, %v541_v14  ;;  %v1930_v36 = vld [vmem:[#allocation2 + $0x30] ss:$2 sm:$0xff]  ;;  %v1948_v47 = vld [vmem:[#allocation2 + $0x31] ss:$2 sm:$0xff] }
  0xb1   : > { %619 = vst.msk [vmem:[#allocation2 + $0x49] sm:$0xff] %vm558_vm2, %v530_v16  ;;  %v798_v38 = vmul.f32 %v1921_v28, %v1930_v36  ;;  %v886_v58 = vmul.f32 %v1945_v44, %v1948_v47  ;;  %v1976_v3 = vld [vmem:[#allocation2 + $0x32] ss:$2 sm:$0xff] }
  0xb2   : > { %v508_v23 = vpop.f32.mrf.mxu3  ;;  %v974_v13 = vmul.f32 %v1971_v0, %v1976_v3  ;;  %v1988_v14 = vld [vmem:[%s2217_s4] ss:$0 sm:$0xff] }
  0xb3   : > { %v478_v21 = vpop.f32.mrf.mxu2  ;;  %v509_v24 = vadd.f32 %v1817_v34, %v508_v23  ;;  %v806_v43 = vadd.f32 %v798_v38, %v788_v37 }
  0xb4   : > { %v479_v22 = vadd.f32 %v1817_v34, %v478_v21  ;;  %v445_v25 = vpop.f32.mrf.mxu0 }
  0xb5   : > { %v446_v30 = vadd.f32 %v1817_v34, %v445_v25  ;;  %v552_v32 = vmax.f32 %v509_v24, 0.0  ;;  %v858_v51 = vadd.f32 %v850_v39, %v806_v43 }
  0xb6   : > { %v542_v29 = vmax.f32 %v479_v22, 0.0  ;;  %v761_v4 = vld [vmem:[#allocation2 + $0x138] ss:$2 sm:$0xff]  ;;  %v1992_v22 = vld [vmem:[#allocation2 + $0x121] ss:$2 sm:$0xff] }
  0xb7   : > { %v531_v35 = vmax.f32 %v446_v30, 0.0  ;;  %641 = vst.msk [vmem:[#allocation2 + $0x151] sm:$0xff] %vm558_vm2, %v552_v32  ;;  %v876_v57 = vadd.f32 %v868_v52, %v858_v51  ;;  %v786_v15 = vmul.f32 %v1908_v18, %v761_v4  ;;  %v841_v25 = vld [vmem:[#allocation2 + $0x139] ss:$2 sm:$0xff]  ;;  %v856_v37 = vmul.f32 %v1927_v33, %v1992_v22  ;;  %v2021_v62 = vld [vmem:[#allocation2 + $0xc0] ss:$2 sm:$0xff] }
  0xb8   : > { %631 = vst.msk [vmem:[#allocation2 + $0xd9] sm:$0xff] %vm558_vm2, %v542_v29  ;;  %v874_v39 = vmul.f32 %v1939_v40, %v841_v25 }
  0xb9   : > { %620 = vst.msk [vmem:[#allocation2 + $0x51] sm:$0xff] %vm558_vm2, %v531_v35  ;;  %v894_v63 = vadd.f32 %v886_v58, %v876_v57  ;;  %v794_v27 = vadd.f32 %v786_v15, %v776_v9 }
  0xba   : > { %v511_v46 = vpop.f32.mrf.mxu3 }
  0xbb   : > { %v481_v42 = vpop.f32.mrf.mxu2  ;;  %v512_v49 = vadd.f32 %v1817_v34, %v511_v46  ;;  %v946_v6 = vadd.f32 %v938_v59, %v894_v63  ;;  %v749_v46 = vld [vmem:[#allocation2 + $0xa8] ss:$2 sm:$0xff] }
  0xbc   : > { %v482_v45 = vadd.f32 %v1817_v34, %v481_v42  ;;  %v448_v50 = vpop.f32.mrf.mxu0  ;;  %v783_v63 = vmul.f32 %v1908_v18, %v749_v46 }
  0xbd   : > { %v449_v55 = vadd.f32 %v1817_v34, %v448_v50  ;;  %v553_v56 = vmax.f32 %v512_v49, 0.0  ;;  %v964_v12 = vadd.f32 %v956_v7, %v946_v6  ;;  %v944_v7 = vmul.f32 %v1955_v53, %v2010_v48 }
  0xbe   : > { %v543_v54 = vmax.f32 %v482_v45, 0.0 }
  0xbf   : > { %v532_v61 = vmax.f32 %v449_v55, 0.0  ;;  %642 = vst.msk [vmem:[#allocation2 + $0x159] sm:$0xff] %vm558_vm2, %v553_v56  ;;  %v982_v21 = vadd.f32 %v974_v13, %v964_v12  ;;  %v2016_v55 = vld [vmem:[#allocation2 + $0x90] ss:$2 sm:$0xff]  ;;  %v801_v12 = vmul.f32 %v1921_v28, %v2021_v62 }
  0xc0   : > { %632 = vst.msk [vmem:[#allocation2 + $0xe1] sm:$0xff] %vm558_vm2, %v543_v54  ;;  %v741_v35 = vld [vmem:[#allocation2 + $0x48] ss:$2 sm:$0xff]  ;;  %v773_v6 = vmul.f32 %v1903_v17, %v2016_v55 }
  0xc1   : > { %621 = vst.msk [vmem:[#allocation2 + $0x61] sm:$0xff] %vm558_vm2, %v532_v61  ;;  %v994_v26 = vadd.f32 %v1988_v14, %v982_v21  ;;  %v781_v54 = vmul.f32 %v1908_v18, %v741_v35  ;;  %v929_v56 = vld [vmem:[#allocation2 + $0x13a] ss:$2 sm:$0xff]  ;;  %v771_v61 = vmul.f32 %v1903_v17, %v1930_v36  ;;  %v851_v21 = vmul.f32 %v1927_v33, %v1948_v47 }
  0xc2   : > { %v514_v8 = vpop.f32.mrf.mxu3 }
  0xc3   : > { %v484_v5 = vpop.f32.mrf.mxu2  ;;  %v515_v10 = vadd.f32 %v1817_v34, %v514_v8  ;;  %v1002_v31 = vmax.f32 %v994_v26, 0.0  ;;  %v962_v8 = vmul.f32 %v1964_v60, %v929_v56  ;;  %v789_v36 = vadd.f32 %v781_v54, %v771_v61 }
  0xc4   : > { %v485_v1 = vadd.f32 %v1817_v34, %v484_v5  ;;  %v451_v11 = vpop.f32.mrf.mxu0 }
  0xc5   : > { %v452_v19 = vadd.f32 %v1817_v34, %v451_v11  ;;  %v554_v20 = vmax.f32 %v515_v10, 0.0  ;;  %1420 = vmatmul.msk.f32.vlgmr.msrb.gmra.mxu1 %vm558_vm2, %v1002_v31  ;;  %v821_v11 = vld [vmem:[#allocation2 + $0x49] ss:$2 sm:$0xff] }
  0xc6   : > { %v544_v16 = vmax.f32 %v485_v1, 0.0  ;;  %v1995_v24 = vld [vmem:[#allocation2 + $0x150] ss:$2 sm:$0xff]  ;;  %v2002_v30 = vld [vmem:[#allocation2 + $0x151] ss:$2 sm:$0xff] }
  0xc7   : > { %v533_v23 = vmax.f32 %v452_v19, 0.0  ;;  %643 = vst.msk [vmem:[#allocation2 + $0x169] sm:$0xff] %vm558_vm2, %v554_v20  ;;  %v804_v29 = vmul.f32 %v1921_v28, %v1995_v24  ;;  %v892_v50 = vmul.f32 %v1945_v44, %v2002_v30  ;;  %v2024_v4 = vld [vmem:[#allocation2 + $0x152] ss:$2 sm:$0xff] }
  0xc8   : > { %633 = vst.msk [vmem:[#allocation2 + $0xf1] sm:$0xff] %vm558_vm2, %v544_v16  ;;  %v980_v15 = vmul.f32 %v1971_v0, %v2024_v4  ;;  %v753_v54 = vld [vmem:[#allocation2 + $0xd8] ss:$2 sm:$0xff] }
  0xc9   : > { %622 = vst.msk [vmem:[#allocation2 + $0x69] sm:$0xff] %vm558_vm2, %v533_v23  ;;  %v812_v38 = vadd.f32 %v804_v29, %v794_v27  ;;  %v2044_v23 = vld [vmem:[#allocation2 + $0x91] ss:$2 sm:$0xff]  ;;  %v791_v29 = vadd.f32 %v783_v63, %v773_v6 }
  0xca   : > { %v517_v42 = vpop.f32.mrf.mxu3 }
  0xcb   : > { %v487_v32 = vpop.f32.mrf.mxu2  ;;  %v518_v43 = vadd.f32 %v1817_v34, %v517_v42  ;;  %v864_v49 = vadd.f32 %v856_v37, %v812_v38  ;;  %v869_v38 = vmul.f32 %v1939_v40, %v821_v11  ;;  %v809_v47 = vadd.f32 %v801_v12, %v791_v29 }
  0xcc   : > { %v488_v41 = vadd.f32 %v1817_v34, %v487_v32  ;;  %v454_v45 = vpop.f32.mrf.mxu0 }
  0xcd   : > { %v455_v52 = vadd.f32 %v1817_v34, %v454_v45  ;;  %v555_v57 = vmax.f32 %v518_v43, 0.0  ;;  %v882_v58 = vadd.f32 %v874_v39, %v864_v49  ;;  %v909_v49 = vld [vmem:[#allocation2 + $0x4a] ss:$2 sm:$0xff] }
  0xce   : > { %v545_v51 = vmax.f32 %v488_v41, 0.0  ;;  %v853_v41 = vmul.f32 %v1927_v33, %v2044_v23 }
  0xcf   : > { %v534_v59 = vmax.f32 %v455_v52, 0.0  ;;  %644 = vst.msk [vmem:[#allocation2 + $0x171] sm:$0xff] %vm558_vm2, %v555_v57  ;;  %v900_v1 = vadd.f32 %v892_v50, %v882_v58  ;;  %v829_v52 = vld [vmem:[#allocation2 + $0xa9] ss:$2 sm:$0xff] }
  0xd0   : > { %634 = vst.msk [vmem:[#allocation2 + $0xf9] sm:$0xff] %vm558_vm2, %v545_v51  ;;  %v2027_v5 = vld [vmem:[#allocation2 + $0x60] ss:$2 sm:$0xff]  ;;  %v2047_v27 = vld [vmem:[#allocation2 + $0x61] ss:$2 sm:$0xff]  ;;  %v939_v51 = vmul.f32 %v1955_v53, %v1976_v3  ;;  %v861_v61 = vadd.f32 %v853_v41, %v809_v47  ;;  %v871_v3 = vmul.f32 %v1939_v40, %v829_v52  ;;  %v800_v47 = vmul.f32 %v1921_v28, %v2016_v55 }
  0xd1   : > { %623 = vst.msk [vmem:[#allocation2 + $0x79] sm:$0xff] %vm558_vm2, %v534_v59  ;;  %v799_v9 = vmul.f32 %v1921_v28, %v2027_v5  ;;  %v952_v13 = vadd.f32 %v944_v7, %v900_v1  ;;  %v887_v46 = vmul.f32 %v1945_v44, %v2047_v27  ;;  %v911_v58 = vld [vmem:[#allocation2 + $0x62] ss:$2 sm:$0xff]  ;;  %v831_v59 = vld [vmem:[#allocation2 + $0xc1] ss:$2 sm:$0xff]  ;;  %v957_v1 = vmul.f32 %v1964_v60, %v909_v49 }
  0xd2   : > { %v520_v19 = vpop.f32.mrf.mxu3  ;;  %v975_v12 = vmul.f32 %v1971_v0, %v911_v58  ;;  %v803_v55 = vmul.f32 %v1921_v28, %v1973_v2  ;;  %v940_v2 = vmul.f32 %v1955_v53, %v911_v58 }
  0xd3   : > { %v490_v10 = vpop.f32.mrf.mxu2  ;;  %v807_v20 = vadd.f32 %v799_v9, %v789_v36  ;;  %v521_v25 = vadd.f32 %v1817_v34, %v520_v19  ;;  %v970_v31 = vadd.f32 %v962_v8, %v952_v13  ;;  %v784_v9 = vmul.f32 %v1908_v18, %v753_v54 }
  0xd4   : > { %v491_v16 = vadd.f32 %v1817_v34, %v490_v10  ;;  %v457_v26 = vpop.f32.mrf.mxu0  ;;  %v889_v13 = vmul.f32 %v1945_v44, %v831_v59  ;;  %v774_v19 = vmul.f32 %v1903_v17, %v2021_v62 }
  0xd5   : > { %v458_v35 = vadd.f32 %v1817_v34, %v457_v26  ;;  %v859_v37 = vadd.f32 %v851_v21, %v807_v20  ;;  %v556_v39 = vmax.f32 %v521_v25, 0.0  ;;  %v988_v42 = vadd.f32 %v980_v15, %v970_v31  ;;  %v2074_v21 = vld [vmem:[#allocation2 + $0x92] ss:$2 sm:$0xff] }
  0xd6   : > { %v546_v32 = vmax.f32 %v491_v16, 0.0  ;;  %v879_v16 = vadd.f32 %v871_v3, %v861_v61  ;;  %v792_v26 = vadd.f32 %v784_v9, %v774_v19  ;;  %v772_v31 = vmul.f32 %v1903_v17, %v2027_v5 }
  0xd7   : > { %v535_v43 = vmax.f32 %v458_v35, 0.0  ;;  %v877_v45 = vadd.f32 %v869_v38, %v859_v37  ;;  %645 = vst.msk [vmem:[#allocation2 + $0x181] sm:$0xff] %vm558_vm2, %v556_v39  ;;  %v2061_v56 = vadd.f32 %v1988_v14, %v988_v42  ;;  %v755_v8 = vld [vmem:[#allocation2 + $0xf0] ss:$2 sm:$0xff]  ;;  %v941_v62 = vmul.f32 %v1955_v53, %v2074_v21  ;;  %v835_v61 = vld [vmem:[#allocation2 + $0xf1] ss:$2 sm:$0xff] }
  0xd8   : > { %635 = vst.msk [vmem:[#allocation2 + $0x109] sm:$0xff] %vm558_vm2, %v546_v32  ;;  %v802_v20 = vmul.f32 %v1921_v28, %v755_v8  ;;  %v765_v35 = vld [vmem:[#allocation2 + $0x168] ss:$2 sm:$0xff]  ;;  %v897_v37 = vadd.f32 %v889_v13, %v879_v16 }
  0xd9   : > { %624 = vst.msk [vmem:[#allocation2 + $0x81] sm:$0xff] %vm558_vm2, %v535_v43  ;;  %v895_v50 = vadd.f32 %v887_v46, %v877_v45  ;;  %v854_v43 = vmul.f32 %v1927_v33, %v831_v59  ;;  %v777_v45 = vmul.f32 %v1903_v17, %v1995_v24  ;;  %v787_v5 = vmul.f32 %v1908_v18, %v765_v35  ;;  %v933_v35 = vld [vmem:[#allocation2 + $0x16a] ss:$2 sm:$0xff] }
  0xda   : > { %v523_v6 = vpop.f32.mrf.mxu3  ;;  %v810_v38 = vadd.f32 %v802_v20, %v792_v26  ;;  %v852_v46 = vmul.f32 %v1927_v33, %v2047_v27  ;;  %v775_v24 = vmul.f32 %v1903_v17, %v755_v8  ;;  %v845_v27 = vld [vmem:[#allocation2 + $0x169] ss:$2 sm:$0xff]  ;;  %v857_v17 = vmul.f32 %v1927_v33, %v2002_v30 }
  0xdb   : > { %v493_v57 = vpop.f32.mrf.mxu2  ;;  %v947_v7 = vadd.f32 %v939_v51, %v895_v50  ;;  %v524_v36 = vadd.f32 %v1817_v34, %v523_v6  ;;  %v833_v50 = vld [vmem:[#allocation2 + $0xd9] ss:$2 sm:$0xff]  ;;  %v949_v51 = vadd.f32 %v941_v62, %v897_v37  ;;  %v795_v3 = vadd.f32 %v787_v5, %v777_v45  ;;  %v923_v37 = vld [vmem:[#allocation2 + $0xf2] ss:$2 sm:$0xff] }
  0xdc   : > { %v494_v63 = vadd.f32 %v1817_v34, %v493_v57  ;;  %v862_v52 = vadd.f32 %v854_v43, %v810_v38  ;;  %v875_v16 = vmul.f32 %v1939_v40, %v845_v27  ;;  %v855_v20 = vmul.f32 %v1927_v33, %v835_v61 }
  0xdd   : > { %v965_v11 = vadd.f32 %v957_v1, %v947_v7  ;;  %v557_v15 = vmax.f32 %v524_v36, 0.0  ;;  %v888_v7 = vmul.f32 %v1945_v44, %v2044_v23  ;;  %v872_v1 = vmul.f32 %v1939_v40, %v833_v50 }
  0xde   : > { %v547_v10 = vmax.f32 %v494_v63, 0.0  ;;  %v891_v38 = vmul.f32 %v1945_v44, %v1992_v22  ;;  %v945_v5 = vmul.f32 %v1955_v53, %v2024_v4  ;;  %v921_v22 = vld [vmem:[#allocation2 + $0xda] ss:$2 sm:$0xff] }
  0xdf   : > { %v983_v34 = vadd.f32 %v975_v12, %v965_v11  ;;  %646 = vst.msk [vmem:[#allocation2 + $0x189] sm:$0xff] %vm558_vm2, %v557_v15  ;;  %v917_v12 = vld [vmem:[#allocation2 + $0xaa] ss:$2 sm:$0xff]  ;;  %v880_v13 = vadd.f32 %v872_v1, %v862_v52  ;;  %v890_v15 = vmul.f32 %v1945_v44, %v835_v61  ;;  %v943_v52 = vmul.f32 %v1955_v53, %v923_v37 }
  0xe0   : > { %636 = vst.msk [vmem:[#allocation2 + $0x111] sm:$0xff] %vm558_vm2, %v547_v10  ;;  %v745_v25 = vld [vmem:[#allocation2 + $0x78] ss:$2 sm:$0xff]  ;;  %v825_v42 = vld [vmem:[#allocation2 + $0x79] ss:$2 sm:$0xff] }
  0xe1   : > { %v995_v29 = vadd.f32 %v1988_v14, %v983_v34  ;;  %v782_v32 = vmul.f32 %v1908_v18, %v745_v25  ;;  %v870_v59 = vmul.f32 %v1939_v40, %v825_v42  ;;  %v898_v62 = vadd.f32 %v890_v15, %v880_v13  ;;  %v1111_v1 = vld [vmem:[#allocation3 + $0x78] ss:$2 sm:$0xff] }
  0xe2   : > { %v1119_v13 = vld [vmem:[#allocation3 + $0xd8] ss:$2 sm:$0xff] }
  0xe3   : > { %v1003_v39 = vmax.f32 %v995_v29, 0.0  ;;  %v790_v41 = vadd.f32 %v782_v32, %v772_v31  ;;  %v919_v29 = vld [vmem:[#allocation2 + $0xc2] ss:$2 sm:$0xff]  ;;  %v959_v31 = vmul.f32 %v1964_v60, %v917_v12  ;;  %v978_v12 = vmul.f32 %v1971_v0, %v923_v37 }
  0xe4   : > { %v942_v43 = vmul.f32 %v1955_v53, %v919_v29  ;;  %v1109_v53 = vld [vmem:[#allocation3 + $0x60] ss:$2 sm:$0xff] }
  0xe5   : > { %1421 = vmatmul.msk.f32.gmra.mxu1 %vm558_vm2, %v1003_v39  ;;  %v808_v49 = vadd.f32 %v800_v47, %v790_v41  ;;  %v967_v41 = vadd.f32 %v959_v31, %v949_v51  ;;  %v1165_v31 = vld [vmem:[#allocation3 + $0xa9] ss:$2 sm:$0xff]  ;;  %v1107_v37 = vld [vmem:[#allocation3 + $0x48] ss:$2 sm:$0xff] }
  0xe6   : > { %v767_v6 = vld [vmem:[#allocation2 + $0x180] ss:$2 sm:$0xff]  ;;  %v847_v8 = vld [vmem:[#allocation2 + $0x181] ss:$2 sm:$0xff] }
  0xe7   : > { %v757_v54 = vld [vmem:[#allocation2 + $0x108] ss:$2 sm:$0xff]  ;;  %v860_v57 = vadd.f32 %v852_v46, %v808_v49  ;;  %v837_v36 = vld [vmem:[#allocation2 + $0x109] ss:$2 sm:$0xff]  ;;  %v805_v9 = vmul.f32 %v1921_v28, %v767_v6  ;;  %v893_v25 = vmul.f32 %v1945_v44, %v847_v8  ;;  %v963_v49 = vmul.f32 %v1964_v60, %v933_v35 }
  0xe8   : > { %v785_v63 = vmul.f32 %v1908_v18, %v757_v54  ;;  %v913_v18 = vld [vmem:[#allocation2 + $0x7a] ss:$2 sm:$0xff]  ;;  %v873_v58 = vmul.f32 %v1939_v40, %v837_v36  ;;  %v976_v40 = vmul.f32 %v1971_v0, %v2074_v21  ;;  %v925_v45 = vld [vmem:[#allocation2 + $0x10a] ss:$2 sm:$0xff]  ;;  %v977_v44 = vmul.f32 %v1971_v0, %v919_v29  ;;  %v1163_v29 = vld [vmem:[#allocation3 + $0x91] ss:$2 sm:$0xff] }
  0xe9   : > { %v878_v10 = vadd.f32 %v870_v59, %v860_v57  ;;  %v813_v23 = vadd.f32 %v805_v9, %v795_v3  ;;  %v958_v30 = vmul.f32 %v1964_v60, %v913_v18  ;;  %v935_v42 = vld [vmem:[#allocation2 + $0x182] ss:$2 sm:$0xff]  ;;  %v950_v21 = vadd.f32 %v942_v43, %v898_v62 }
  0xea   : > { %v793_v11 = vadd.f32 %v785_v63, %v775_v24  ;;  %v985_v59 = vadd.f32 %v977_v44, %v967_v41  ;;  %v961_v4 = vmul.f32 %v1964_v60, %v925_v45  ;;  %v960_v24 = vmul.f32 %v1964_v60, %v921_v22  ;;  %v1101_v9 = vld [vmem:[#allocation3] ss:$2 sm:$0xff]  ;;  %v1113_v8 = vld [vmem:[#allocation3 + $0x90] ss:$2 sm:$0xff]  ;;  %v1151_v41 = vld [vmem:[#allocation3 + $0x1] ss:$2 sm:$0xff] }
  0xeb   : > { %v896_v19 = vadd.f32 %v888_v7, %v878_v10  ;;  %v865_v34 = vadd.f32 %v857_v17, %v813_v23  ;;  %v979_v7 = vmul.f32 %v1971_v0, %v2010_v48  ;;  %v1136_v3 = vadd.f32 %v1111_v1, %v1109_v53  ;;  %v1115_v60 = vld [vmem:[#allocation3 + $0xa8] ss:$2 sm:$0xff]  ;;  %v1153_v45 = vld [vmem:[#allocation3 + $0x19] ss:$2 sm:$0xff]  ;;  %v1157_v44 = vld [vmem:[#allocation3 + $0x49] ss:$2 sm:$0xff] }
  0xec   : > { %v811_v28 = vadd.f32 %v803_v55, %v793_v11  ;;  %v981_v55 = vmul.f32 %v1971_v0, %v935_v42  ;;  %v968_v36 = vadd.f32 %v960_v24, %v950_v21  ;;  %v997_v11 = vadd.f32 %v1988_v14, %v985_v59  ;;  %v1117_v18 = vld [vmem:[#allocation3 + $0xc0] ss:$2 sm:$0xff]  ;;  %v2136_v0 = vld [vmem:[#allocation3 + $0xf0] ss:$2 sm:$0xff] }
  0xed   : > { %v948_v26 = vadd.f32 %v940_v2, %v896_v19  ;;  %v883_v33 = vadd.f32 %v875_v16, %v865_v34  ;;  %v1103_v2 = vld [vmem:[#allocation3 + $0x18] ss:$2 sm:$0xff]  ;;  %v1137_v15 = vadd.f32 %v1115_v60, %v1113_v8  ;;  %v1144_v48 = vadd.f32 %v1136_v3, %v1113_v8  ;;  %v1159_v19 = vld [vmem:[#allocation3 + $0x61] ss:$2 sm:$0xff] }
  0xee   : > { %v863_v32 = vadd.f32 %v855_v20, %v811_v28  ;;  %v1161_v20 = vld [vmem:[#allocation3 + $0x79] ss:$2 sm:$0xff]  ;;  %v1134_v28 = vadd.f32 %v1103_v2, %v1101_v9  ;;  %v1105_v62 = vld [vmem:[#allocation3 + $0x30] ss:$2 sm:$0xff]  ;;  %v2144_v2 = vld [vmem:[#allocation3 + $0x120] ss:$2 sm:$0xff] }
  0xef   : > { %v966_v39 = vadd.f32 %v958_v30, %v948_v26  ;;  %v901_v46 = vadd.f32 %v893_v25, %v883_v33  ;;  %v1145_v34 = vadd.f32 %v1137_v15, %v1117_v18  ;;  %v1186_v25 = vadd.f32 %v1159_v19, %v1144_v48  ;;  %v2138_v33 = vld [vmem:[#allocation3 + $0x62] ss:$2 sm:$0xff]  ;;  %v1213_v60 = vld [vmem:[#allocation3 + $0x32] ss:$2 sm:$0xff] }
  0xf0   : > { %v881_v47 = vadd.f32 %v873_v58, %v863_v32  ;;  %v986_v58 = vadd.f32 %v978_v12, %v968_v36  ;;  %v1005_v26 = vmax.f32 %v997_v11, 0.0  ;;  %v1138_v30 = vadd.f32 %v1119_v13, %v1117_v18  ;;  %v1129_v21 = vld [vmem:[#allocation3 + $0x150] ss:$2 sm:$0xff]  ;;  %v1181_v18 = vld [vmem:[#allocation3 + $0x169] ss:$2 sm:$0xff] }
  0xf1   : > { %v984_v50 = vadd.f32 %v976_v40, %v966_v39  ;;  %v953_v51 = vadd.f32 %v945_v5, %v901_v46  ;;  %v1187_v32 = vadd.f32 %v1163_v29, %v1145_v34  ;;  %v1194_v35 = vadd.f32 %v1186_v25, %v1161_v20  ;;  %v1219_v46 = vld [vmem:[#allocation3 + $0x7a] ss:$2 sm:$0xff]  ;;  %v1215_v15 = vld [vmem:[#allocation3 + $0x4a] ss:$2 sm:$0xff] }
  0xf2   : > { %v899_v54 = vadd.f32 %v891_v38, %v881_v47  ;;  %v1167_v38 = vld [vmem:[#allocation3 + $0xc1] ss:$2 sm:$0xff]  ;;  %v1135_v39 = vadd.f32 %v1107_v37, %v1105_v62  ;;  %v1142_v40 = vadd.f32 %v1134_v28, %v1105_v62  ;;  %v998_v47 = vadd.f32 %v1988_v14, %v986_v58  ;;  %v1225_v3 = vld [vmem:[#allocation3 + $0xc2] ss:$2 sm:$0xff] }
  0xf3   : > { %v996_v57 = vadd.f32 %v1988_v14, %v984_v50  ;;  %v971_v63 = vadd.f32 %v963_v49, %v953_v51  ;;  %v1195_v42 = vadd.f32 %v1187_v32, %v1165_v31  ;;  %v1202_v43 = vadd.f32 %v1194_v35, %v1163_v29  ;;  %v1155_v50 = vld [vmem:[#allocation3 + $0x31] ss:$2 sm:$0xff]  ;;  %v1131_v51 = vld [vmem:[#allocation3 + $0x168] ss:$2 sm:$0xff]  ;;  %v2147_v28 = vld [vmem:[#allocation3 + $0x121] ss:$2 sm:$0xff] }
  0xf4   : > { %v951_v61 = vadd.f32 %v943_v52, %v899_v54  ;;  %v1146_v5 = vadd.f32 %v1138_v30, %v2136_v0  ;;  %v1143_v49 = vadd.f32 %v1135_v39, %v1109_v53  ;;  %v1184_v22 = vadd.f32 %v1151_v41, %v1142_v40  ;;  %v1211_v8 = vld [vmem:[#allocation3 + $0x1a] ss:$2 sm:$0xff]  ;;  %v1169_v58 = vld [vmem:[#allocation3 + $0xd9] ss:$2 sm:$0xff] }
  0xf5   : > { %v1004_v6 = vmax.f32 %v996_v57, 0.0  ;;  %v989_v10 = vadd.f32 %v981_v55, %v971_v63  ;;  %v1203_v52 = vadd.f32 %v1195_v42, %v1167_v38  ;;  %v1244_v54 = vadd.f32 %v2138_v33, %v1202_v43  ;;  %v1133_v55 = vld [vmem:[#allocation3 + $0x180] ss:$2 sm:$0xff]  ;;  %v1171_v29 = vld [vmem:[#allocation3 + $0xf1] ss:$2 sm:$0xff] }
  0xf6   : > { %v969_v27 = vadd.f32 %v961_v4, %v951_v61  ;;  %v1221_v57 = vld [vmem:[#allocation3 + $0x92] ss:$2 sm:$0xff]  ;;  %v1185_v59 = vadd.f32 %v1155_v50, %v1143_v49  ;;  %v1192_v61 = vadd.f32 %v1184_v22, %v1153_v45  ;;  %v1141_v4 = vadd.f32 %v1131_v51, %v1129_v21  ;;  %v1177_v62 = vld [vmem:[#allocation3 + $0x139] ss:$2 sm:$0xff]  ;;  %v1233_v22 = vld [vmem:[#allocation3 + $0x122] ss:$2 sm:$0xff] }
  0xf7   : > { %1422 = vmatmul.msk.f32.gmra.mxu1 %vm558_vm2, %v1004_v6  ;;  %v2131_v23 = vadd.f32 %v1988_v14, %v989_v10  ;;  %v1006_v24 = vmax.f32 %v998_v47, 0.0  ;;  %v1245_v63 = vadd.f32 %v1221_v57, %v1203_v52  ;;  %v1252_v6 = vadd.f32 %v1244_v54, %v1219_v46  ;;  %v1127_v10 = vld [vmem:[#allocation3 + $0x138] ss:$2 sm:$0xff] }
  0xf8   : > { %v987_v17 = vadd.f32 %v979_v7, %v969_v27  ;;  %v1209_v27 = vld [vmem:[#allocation3 + $0x2] ss:$2 sm:$0xff]  ;;  %v1179_v7 = vld [vmem:[#allocation3 + $0x151] ss:$2 sm:$0xff]  ;;  %v1188_v53 = vadd.f32 %v1167_v38, %v1146_v5  ;;  %v1193_v1 = vadd.f32 %v1185_v59, %v1157_v44  ;;  %v1200_v36 = vadd.f32 %v1192_v61, %v1155_v50  ;;  %v1229_v51 = vld [vmem:[#allocation3 + $0xf2] ss:$2 sm:$0xff] }
  0xf9   : > { %v1149_v9 = vadd.f32 %v1141_v4, %v1133_v55  ;;  %v1140_v12 = vadd.f32 %v1127_v10, %v2144_v2  ;;  %v1239_v45 = vld [vmem:[#allocation3 + $0x16a] ss:$2 sm:$0xff]  ;;  %v1227_v46 = vld [vmem:[#allocation3 + $0xda] ss:$2 sm:$0xff] }
  0xfa   : > { %v2134_v16 = vadd.f32 %v1988_v14, %v987_v17  ;;  %v1223_v14 = vld [vmem:[#allocation3 + $0xaa] ss:$2 sm:$0xff]  ;;  %v1260_v17 = vadd.f32 %v1252_v6, %v1221_v57  ;;  %v1201_v13 = vadd.f32 %v1193_v1, %v1159_v19  ;;  %v1242_v48 = vadd.f32 %v1209_v27, %v1200_v36  ;;  %v1235_v61 = vld [vmem:[#allocation3 + $0x13a] ss:$2 sm:$0xff] }
  0xfb   : > { %v1253_v11 = vadd.f32 %v1245_v63, %v1223_v14  ;;  %v1191_v20 = vadd.f32 %v1179_v7, %v1149_v9  ;;  %v1148_v30 = vadd.f32 %v1140_v12, %v1129_v21  ;;  %v1196_v37 = vadd.f32 %v1188_v53, %v1169_v58  ;;  %v1237_v19 = vld [vmem:[#allocation3 + $0x152] ss:$2 sm:$0xff]  ;;  %v1241_v54 = vld [vmem:[#allocation3 + $0x182] ss:$2 sm:$0xff] }
  0xfc   : > { %v1268_v34 = vmul.f32 0.11111111, %v1260_v17  ;;  %v1243_v31 = vadd.f32 %v1213_v60, %v1201_v13  ;;  %v1250_v32 = vadd.f32 %v1242_v48, %v1211_v8  ;;  %v1007_v55 = vmax.f32 %v2134_v16, 0.0  ;;  %v1123_v57 = vld [vmem:[#allocation3 + $0x108] ss:$2 sm:$0xff] }
  0xfd   : > { %v1261_v25 = vadd.f32 %v1253_v11, %v1225_v3  ;;  %v1199_v35 = vadd.f32 %v1191_v20, %v1181_v18  ;;  %v1190_v39 = vadd.f32 %v2147_v28, %v1148_v30  ;;  %v1204_v42 = vadd.f32 %v1196_v37, %v1171_v29 }
  0xfe   : > { %v1276_v38 = vmax.f32 %v1268_v34, 0.0  ;;  %v1251_v40 = vadd.f32 %v1243_v31, %v1215_v15  ;;  %v1258_v41 = vadd.f32 %v1250_v32, %v1213_v60  ;;  %v1139_v53 = vadd.f32 %v1123_v57, %v2136_v0  ;;  %v1173_v60 = vld [vmem:[#allocation3 + $0x109] ss:$2 sm:$0xff]  ;;  %v1231_v15 = vld [vmem:[#allocation3 + $0x10a] ss:$2 sm:$0xff] }
  0xff   : > { %1423 = vmatmul.msk.f32.gmra.mxu1 %vm558_vm2, %v1005_v26  ;;  %v1183_v26 = vld [vmem:[#allocation3 + $0x181] ss:$2 sm:$0xff]  ;;  %v1269_v43 = vmul.f32 0.11111111, %v1261_v25  ;;  %v1198_v5 = vadd.f32 %v1190_v39, %v1177_v62  ;;  %v1246_v52 = vadd.f32 %v1225_v3, %v1204_v42  ;;  %v1008_v11 = vmax.f32 %v2061_v56, 0.0 }
 0x100   : > { %v1207_v47 = vadd.f32 %v1199_v35, %v1183_v26  ;;  %1294 = vrot.lane.b32.xlu1 %v1276_v38, %s1466_s12  ;;  %v1266_v49 = vmul.f32 0.11111111, %v1258_v41  ;;  %v1259_v50 = vadd.f32 %v1251_v40, %v2138_v33  ;;  %v1147_v10 = vadd.f32 %v1139_v53, %v2144_v2  ;;  %v1456_v25 = vld [vmem:[%s2219_s6] ss:$0 sm:$0xff] }
 0x101   : > { %v1206_v21 = vadd.f32 %v1198_v5, %v1179_v7  ;;  %v1254_v4 = vadd.f32 %v1246_v52, %v1227_v46  ;;  %v1009_v13 = vmax.f32 %v2131_v23, 0.0 }
 0x102   : > { %v1249_v44 = vadd.f32 %v1237_v19, %v1207_v47  ;;  %v1274_v14 = vmax.f32 %v1266_v49, 0.0  ;;  %v1267_v33 = vmul.f32 0.11111111, %v1259_v50  ;;  %v1189_v8 = vadd.f32 %v1171_v29, %v1147_v10 }
 0x103   : > { %v1248_v63 = vadd.f32 %v1233_v22, %v1206_v21  ;;  %v1262_v27 = vadd.f32 %v1254_v4, %v1229_v51 }
 0x104   : > { %v1257_v59 = vadd.f32 %v1249_v44, %v1239_v45  ;;  %1290 = vrot.lane.b32.xlu0 %v1274_v14, %s1466_s12  ;;  %v1275_v36 = vmax.f32 %v1267_v33, 0.0  ;;  %v1197_v12 = vadd.f32 %v1189_v8, %v1173_v60 }
 0x105   : > { %v1256_v7 = vadd.f32 %v1248_v63, %v1235_v61  ;;  %v1270_v1 = vmul.f32 0.11111111, %v1262_v27 }
 0x106   : > { %v1265_v6 = vadd.f32 %v1257_v59, %v1241_v54  ;;  %v1205_v56 = vadd.f32 %v1197_v12, %v2147_v28 }
 0x107   : > { %1424 = vmatmul.msk.f32.gmra.mxu1 %vm558_vm2, %v1006_v24  ;;  %v1277_v24 = vmax.f32 %v1269_v43, 0.0  ;;  %v1264_v3 = vadd.f32 %v1256_v7, %v1237_v19  ;;  %v1278_v9 = vmax.f32 %v1270_v1, 0.0 }
 0x108   : > { %v1273_v16 = vmul.f32 0.11111111, %v1265_v6  ;;  %v1247_v2 = vadd.f32 %v1229_v51, %v1205_v56 }
 0x109   : > { %1296 = vrot.lane.b32.xlu1 %v1277_v24, %s1466_s12  ;;  %1298 = vrot.lane.b32.xlu2 %v1278_v9, %s1466_s12  ;;  %v1272_v0 = vmul.f32 0.11111111, %v1264_v3 }
 0x10a   : > { %v1281_v17 = vmax.f32 %v1273_v16, 0.0  ;;  %v1255_v48 = vadd.f32 %v1247_v2, %v1231_v15 }
 0x10b   : > { %v1280_v18 = vmax.f32 %v1272_v0, 0.0 }
 0x10c   : > { %1292 = vrot.lane.b32.xlu0 %v1275_v36, %s1466_s12  ;;  %v1263_v20 = vadd.f32 %v1255_v48, %v1233_v22 }
 0x10e   : > { %v1271_v58 = vmul.f32 0.11111111, %v1263_v20 }
 0x10f   : > { %1425 = vmatmul.msk.f32.gmra.mxu1 %vm558_vm2, %v1007_v55 }
 0x110   : > { %v1279_v34 = vmax.f32 %v1271_v58, 0.0 }
 0x111   : > { %1304 = vrot.lane.b32.xlu1 %v1281_v17, %s1466_s12 }
 0x112   : > { %1300 = vrot.lane.b32.xlu2 %v1279_v34, %s1466_s12 }
 0x114   : > { %1302 = vrot.lane.b32.xlu0 %v1280_v18, %s1466_s12 }
 0x117   : > { %1426 = vmatmul.msk.f32.gmra.mxu1 %vm558_vm2, %v1008_v11 }
 0x11f   : > { %1427 = vmatmul.msk.f32.gmra.mxu1 %vm558_vm2, %v1009_v13 }
 0x142   : > { %v1060_v23 = vpop.f32.mrf.mxu1 }
 0x143   : > { %v1061_v26 = vadd.f32 %v1456_v25, %v1060_v23 }
 0x145   : > { %v1084_v28 = vmax.f32 %v1061_v26, 0.0 }
 0x147   : > { %1093 = vst.msk [vmem:[%s2176_s18] sm:$0xff] %vm1092_vm5, %v1084_v28 }
 0x162   : > { %v1063_v30 = vpop.f32.mrf.mxu1 }
 0x163   : > { %v1064_v29 = vadd.f32 %v1456_v25, %v1063_v30  ;;  %v1299_v43 = vpop.permute.xlu2 %1298 }
 0x165   : > { %v1085_v31 = vmax.f32 %v1064_v29, 0.0 }
 0x167   : > { %1094 = vst.msk [vmem:[%s2176_s18 + $0x8] sm:$0xff] %vm1092_vm5, %v1085_v31 }
 0x16c   : > { %v1301_v44 = vpop.permute.xlu2 %1300 }
 0x172   : > { %v1295_v38 = vpop.permute.xlu1 %1294 }
 0x174   : > { %v1066_v32 = vpop.f32.mrf.mxu1 }
 0x175   : > { %v1067_v35 = vadd.f32 %v1456_v25, %v1066_v32 }
 0x176   : > { %v1291_v40 = vpop.permute.xlu0 %1290 }
 0x177   : > { %v1086_v62 = vmax.f32 %v1067_v35, 0.0  ;;  %1315 = vst.msk [vmem:[%s2176_s18] sm:$0xff] %vm1314_vm6, %v1291_v40 }
 0x179   : > { %1095 = vst.msk [vmem:[%s2176_s18 + $0x10] sm:$0xff] %vm1092_vm5, %v1086_v62 }
 0x17a   : > { %1317 = vst.msk [vmem:[%s2176_s18 + $0x10] sm:$0xff] %vm1314_vm6, %v1295_v38 }
 0x17b   : > { %v1297_v47 = vpop.permute.xlu1 %1296 }
 0x17c   : > { %v1069_v37 = vpop.f32.mrf.mxu1 }
 0x17d   : > { %v1070_v19 = vadd.f32 %v1456_v25, %v1069_v37 }
 0x17e   : > { %v1293_v5 = vpop.permute.xlu0 %1292 }
 0x17f   : > { %v1087_v39 = vmax.f32 %v1070_v19, 0.0  ;;  %1316 = vst.msk [vmem:[%s2176_s18 + $0x8] sm:$0xff] %vm1314_vm6, %v1293_v5 }
 0x181   : > { %1096 = vst.msk [vmem:[%s2176_s18 + $0x18] sm:$0xff] %vm1092_vm5, %v1087_v39 }
 0x182   : > { %1318 = vst.msk [vmem:[%s2176_s18 + $0x18] sm:$0xff] %vm1314_vm6, %v1297_v47 }
 0x183   : > { %v1305_v14 = vpop.permute.xlu1 %1304 }
 0x184   : > { %v1072_v41 = vpop.f32.mrf.mxu1 }
 0x185   : > { %v1073_v42 = vadd.f32 %v1456_v25, %v1072_v41 }
 0x186   : > { %v1303_v21 = vpop.permute.xlu0 %1302 }
 0x187   : > { %v1088_v45 = vmax.f32 %v1073_v42, 0.0 }
 0x189   : > { %1097 = vst.msk [vmem:[%s2176_s18 + $0x20] sm:$0xff] %vm1092_vm5, %v1088_v45 }
 0x18a   : > { %1319 = vst.msk [vmem:[%s2176_s18 + $0x20] sm:$0xff] %vm1314_vm6, %v1299_v43 }
 0x18c   : > { %v1075_v46 = vpop.f32.mrf.mxu1 }
 0x18d   : > { %v1076_v49 = vadd.f32 %v1456_v25, %v1075_v46 }
 0x18f   : > { %v1089_v50 = vmax.f32 %v1076_v49, 0.0 }
 0x191   : > { %1098 = vst.msk [vmem:[%s2176_s18 + $0x28] sm:$0xff] %vm1092_vm5, %v1089_v50 }
 0x192   : > { %1320 = vst.msk [vmem:[%s2176_s18 + $0x28] sm:$0xff] %vm1314_vm6, %v1301_v44 }
 0x194   : > { %v1078_v22 = vpop.f32.mrf.mxu1 }
 0x195   : > { %v1079_v52 = vadd.f32 %v1456_v25, %v1078_v22 }
 0x197   : > { %v1090_v54 = vmax.f32 %v1079_v52, 0.0 }
 0x199   : > { %1099 = vst.msk [vmem:[%s2176_s18 + $0x30] sm:$0xff] %vm1092_vm5, %v1090_v54 }
 0x19a   : > { %1321 = vst.msk [vmem:[%s2176_s18 + $0x30] sm:$0xff] %vm1314_vm6, %v1303_v21 }
 0x19c   : > { %v1081_v51 = vpop.f32.mrf.mxu1 }
 0x19d   : > { %v1082_v55 = vadd.f32 %v1456_v25, %v1081_v51 }
 0x19f   : > { %v1091_v57 = vmax.f32 %v1082_v55, 0.0 }
 0x1a1   : > { %1100 = vst.msk [vmem:[%s2176_s18 + $0x38] sm:$0xff] %vm1092_vm5, %v1091_v57 }
 0x1a2   : > { %1322 = vst.msk [vmem:[%s2176_s18 + $0x38] sm:$0xff] %vm1314_vm6, %v1305_v14 }
 0x1a3 PF: > { %s17_s24 = sadd.s32 1, %s1463_s24  }
 0x1a4   : > { %p14_p4 = scmp.ge.s32.totalorder %s17_s24, 4  }
 0x1a6   :  { %16 = sbr.rel (!%p14_p4) target bundleno = 1 (0x1), region = 180 }

</bundles_post_ra>
